<compile_context>
chip_gen: v7x
topology: tpu7x:2x2x1
jax: 0.10.0
libtpu: 0.0.40
codegen_flags: <defaults>
</compile_context>

<pallas_src>
import math
import functools

import jax
import jax.numpy as jnp
from jax.experimental import pallas as pl
from jax.experimental.pallas import tpu as pltpu

D_FF = 2048
H = 8
LN_EPS = 1e-5


def encoder_kernel(x_ref,
                   wqkv_ref, bqkv_ref, wo_ref, bo_ref,
                   g1_ref, beta1_ref,
                   w1_ref, b1_ref, w2_ref, b2_ref,
                   g2_ref, beta2_ref,
                   maskexp_ref, bsum_ref,
                   out_ref,
                   *, seq_len, n_heads):
    x = x_ref[...]                       # (T, D) f32, T = TB*seq_len flattened tokens
    T, D = x.shape
    S = seq_len
    TB = T // S                          # whole sequences in this tile (static)
    M = n_heads * S                      # expanded key axis: head-major blocks of S
    dk = D // n_heads
    scale = 1.0 / math.sqrt(dk)

    xb = x.astype(jnp.bfloat16)

    # ---- fused Q/K/V projection: one (T, D) x (D, 3D) bf16 MXU matmul -------
    qkv = jnp.dot(xb, wqkv_ref[...],
                  preferred_element_type=jnp.float32) + bqkv_ref[...]
    q = qkv[:, 0 * D:1 * D]              # lane slices at 128-multiples (layout-free)
    k = qkv[:, 1 * D:2 * D]
    v = qkv[:, 2 * D:3 * D]

    # ---- per-sequence split: leading-dim reshape only (sublane-aligned, free)
    q3 = q.reshape(TB, S, D).astype(jnp.bfloat16)
    k3 = k.reshape(TB, S, D)             # keep f32 for the mask multiply
    v3 = v.reshape(TB, S, D)

    # ---- head handling without transposes / sub-tile lane slices ------------
    # maskexp[m, :] is the 0/1 lane-block indicator of head (m // S).
    # kexp[b, h*S + j, :] = k[b, j, :] masked to head h's lanes (lane-dense rows).
    maskexp = maskexp_ref[...]           # (M, D) f32
    kexp = (jnp.concatenate([k3] * n_heads, axis=1) * maskexp).astype(jnp.bfloat16)
    vexp = (jnp.concatenate([v3] * n_heads, axis=1) * maskexp).astype(jnp.bfloat16)

    # scores[b, i, h*S + j] = <q_head_h[b,i,:], k_head_h[b,j,:]>  (zero lanes of
    # kexp kill the other heads' contribution).  One batched matmul per tile.
    scores = jnp.einsum('bqd,bmd->bqm', q3, kexp,
                        preferred_element_type=jnp.float32) * scale   # (TB, S, M)
    # row-wise shift (constant per query row -> cancels in each head's softmax)
    scores = scores - jnp.max(scores, axis=-1, keepdims=True)
    e = jnp.exp(scores)

    # per-head denominator via block-diagonal ones matmul (f32, exact blocks)
    e2 = e.reshape(T, M)
    denom = jnp.dot(e2, bsum_ref[...], preferred_element_type=jnp.float32)
    p = (e2 * pl.reciprocal(denom, approx=True)).reshape(TB, S, M).astype(jnp.bfloat16)

    # P@V directly yields the merged multi-head output in token-major (T, D)
    # layout (lane-dense N = D); no scratch, no masked stores, no re-layout.
    merged = jnp.einsum('bqm,bmd->bqd', p, vexp,
                        preferred_element_type=jnp.float32).reshape(T, D)

    attn = jnp.dot(merged.astype(jnp.bfloat16), wo_ref[...],
                   preferred_element_type=jnp.float32) + bo_ref[...]

    # ---- residual + LayerNorm 1 (dropout = identity) ------------------------
    r1 = x + attn
    mu1 = jnp.mean(r1, axis=-1, keepdims=True)
    var1 = jnp.mean((r1 - mu1) ** 2, axis=-1, keepdims=True)
    y = (r1 - mu1) * jax.lax.rsqrt(var1 + LN_EPS) * g1_ref[...] + beta1_ref[...]

    # ---- FeedForward: Linear -> ReLU -> Linear (bf16 matmuls, f32 accum) ----
    h1 = jnp.dot(y.astype(jnp.bfloat16), w1_ref[...],
                 preferred_element_type=jnp.float32) + b1_ref[...]
    h1 = jnp.maximum(h1, 0.0)
    ff = jnp.dot(h1.astype(jnp.bfloat16), w2_ref[...],
                 preferred_element_type=jnp.float32) + b2_ref[...]

    # ---- residual + LayerNorm 2 (dropout = identity) ------------------------
    r2 = y + ff
    mu2 = jnp.mean(r2, axis=-1, keepdims=True)
    var2 = jnp.mean((r2 - mu2) ** 2, axis=-1, keepdims=True)
    out_ref[...] = (r2 - mu2) * jax.lax.rsqrt(var2 + LN_EPS) * g2_ref[...] + beta2_ref[...]


def encoder_forward(x, params, *, target_tile_tokens=256):
    """x: (B, S, D) float32.  params: the 16 PyTorch-style parameter arrays.

    target_tile_tokens ~256 suits v6e/v7x (2x256 MXU); push to 512-1024 on v6e
    (128 MiB VMEM) for large batches.
    """
    (wq, bq, wk, bk, wv, bv, wo, bo, g1, beta1,
     w1, b1, w2, b2, g2, beta2) = params
    B, S, D = x.shape
    dk = D // H
    M = H * S

    # Token tile = as many WHOLE sequences as fit the token budget; pad the
    # batch with zero sequences so the tile count need not divide B.
    TB = max(1, min(B, target_tile_tokens // S))
    Bp = -(-B // TB) * TB
    if Bp != B:
        x = jnp.concatenate([x, jnp.zeros((Bp - B, S, D), x.dtype)], axis=0)
    T = TB * S

    # Attention helper constants (built once in the wrapper).
    head_of_row = jnp.arange(M) // S                     # (M,)  head id of expanded row
    head_of_lane = jnp.arange(D) // dk                   # (D,)  head id of lane
    maskexp = (head_of_row[:, None] == head_of_lane[None, :]).astype(jnp.float32)  # (M, D)
    bsum = (head_of_row[:, None] == head_of_row[None, :]).astype(jnp.float32)      # (M, M)

    # Pack / pre-cast parameters once (matmul operands -> bf16).
    wqkv = jnp.concatenate([wq, wk, wv], axis=1).astype(jnp.bfloat16)   # (D, 3D)
    bqkv = jnp.concatenate([bq, bk, bv], axis=1).astype(jnp.float32)    # (1, 3D)
    kparams = [wqkv, bqkv,
               wo.astype(jnp.bfloat16), bo,
               g1, beta1,
               w1.astype(jnp.bfloat16), b1,
               w2.astype(jnp.bfloat16), b2,
               g2, beta2,
               maskexp, bsum]

    x2 = x.reshape(Bp * S, D)            # lane-dense (tokens, D) slab

    def const_spec(p):                   # whole parameter resident every step
        return pl.BlockSpec(p.shape, lambda i: (0, 0))

    kernel = functools.partial(encoder_kernel, seq_len=S, n_heads=H)

    out2 = pl.pallas_call(
        kernel,
        out_shape=jax.ShapeDtypeStruct((Bp * S, D), jnp.float32),
        grid_spec=pltpu.PrefetchScalarGridSpec(
            num_scalar_prefetch=0,
            grid=(Bp // TB,),
            in_specs=[pl.BlockSpec((T, D), lambda i: (i, 0))]
                     + [const_spec(p) for p in kparams],
            out_specs=pl.BlockSpec((T, D), lambda i: (i, 0)),
        ),
        compiler_params=pltpu.CompilerParams(
            dimension_semantics=("parallel",),
            vmem_limit_bytes=48 * 1024 * 1024,   # leave headroom on v7x (64 MiB VMEM)
        ),
    )(x2, *kparams)

    return out2.reshape(Bp, S, D)[:B]


def make_params(d_model, key):
    ks = jax.random.split(key, 12)
    init = lambda k, shape: (0.02 * jax.random.normal(k, shape)).astype(jnp.float32)
    wq = init(ks[0], (d_model, d_model)); bq = init(ks[1], (1, d_model))
    wk = init(ks[2], (d_model, d_model)); bk = init(ks[3], (1, d_model))
    wv = init(ks[4], (d_model, d_model)); bv = init(ks[5], (1, d_model))
    wo = init(ks[6], (d_model, d_model)); bo = init(ks[7], (1, d_model))
    g1 = jnp.ones((1, d_model), jnp.float32); beta1 = jnp.zeros((1, d_model), jnp.float32)
    w1 = init(ks[8], (d_model, D_FF)); b1 = init(ks[9], (1, D_FF))
    w2 = init(ks[10], (D_FF, d_model)); b2 = init(ks[11], (1, d_model))
    g2 = jnp.ones((1, d_model), jnp.float32); beta2 = jnp.zeros((1, d_model), jnp.float32)
    return [wq, bq, wk, bk, wv, bv, wo, bo, g1, beta1, w1, b1, w2, b2, g2, beta2]


def encoder_reference(x, params):
    """Plain-JAX f32 reference with identical forward semantics."""
    (wq, bq, wk, bk, wv, bv, wo, bo, g1, beta1,
     w1, b1, w2, b2, g2, beta2) = params
    B, S, D = x.shape
    dk = D // H
    q = (x @ wq + bq).reshape(B, S, H, dk)
    k = (x @ wk + bk).reshape(B, S, H, dk)
    v = (x @ wv + bv).reshape(B, S, H, dk)
    scores = jnp.einsum("bqhd,bkhd->bhqk", q, k) / math.sqrt(dk)
    p = jax.nn.softmax(scores, axis=-1)
    o = jnp.einsum("bhqk,bkhd->bqhd", p, v).reshape(B, S, D)
    attn = o @ wo + bo

    def ln(z, g, b):
        mu = jnp.mean(z, axis=-1, keepdims=True)
        var = jnp.mean((z - mu) ** 2, axis=-1, keepdims=True)
        return (z - mu) * jax.lax.rsqrt(var + LN_EPS) * g + b

    y = ln(x + attn, g1, beta1)
    ff = jnp.maximum(y @ w1 + b1, 0.0) @ w2 + b2
    return ln(y + ff, g2, beta2)


if __name__ == "__main__":
    B, S, D = 2, 8, 128          # d_model=128 -> lane-dense last dim, d_k=16 (h=8)
    key = jax.random.PRNGKey(0)
    kx, kp = jax.random.split(key)
    x = jax.random.normal(kx, (B, S, D), dtype=jnp.float32)
    params = make_params(D, kp)

    out = encoder_forward(x, params)
    out = jax.block_until_ready(out)

    ref = jax.block_until_ready(encoder_reference(x, params))
    assert out.shape == (B, S, D)
    err = jnp.max(jnp.abs(out - ref))
    # bf16 matmuls + approx reciprocal vs f32 reference -> loose tolerance
    assert jnp.allclose(out, ref, atol=2e-2, rtol=2e-2), f"max abs err {err}"
    print("KERNEL_OK")
</pallas_src>

<mosaic_0001>
module attributes {stable_mosaic.version = 11 : i64} {
  func.func @encoder_kernel(%arg0: i32, %arg1: memref<16x128xf32, #tpu.memory_space<vmem>>, %arg2: memref<128x384xbf16, #tpu.memory_space<vmem>>, %arg3: memref<1x384xf32, #tpu.memory_space<vmem>>, %arg4: memref<128x128xbf16, #tpu.memory_space<vmem>>, %arg5: memref<1x128xf32, #tpu.memory_space<vmem>>, %arg6: memref<1x128xf32, #tpu.memory_space<vmem>>, %arg7: memref<1x128xf32, #tpu.memory_space<vmem>>, %arg8: memref<128x2048xbf16, #tpu.memory_space<vmem>>, %arg9: memref<1x2048xf32, #tpu.memory_space<vmem>>, %arg10: memref<2048x128xbf16, #tpu.memory_space<vmem>>, %arg11: memref<1x128xf32, #tpu.memory_space<vmem>>, %arg12: memref<1x128xf32, #tpu.memory_space<vmem>>, %arg13: memref<1x128xf32, #tpu.memory_space<vmem>>, %arg14: memref<64x128xf32, #tpu.memory_space<vmem>>, %arg15: memref<64x64xf32, #tpu.memory_space<vmem>>, %arg16: memref<16x128xf32, #tpu.memory_space<vmem>>) attributes {dimension_semantics = [#tpu.dimension_semantics<parallel>], iteration_bounds = array<i64: 1>, scalar_prefetch = 0 : i64, scratch_operands = 0 : i64, tpu.core_type = #tpu.core_type<tc>, window_params = [{transform_indices = @transform_0, window_bounds = array<i64: 16, 128>}, {pipeline_mode = #tpu.pipeline_mode<synchronous>, transform_indices = @transform_1, window_bounds = array<i64: 128, 384>}, {pipeline_mode = #tpu.pipeline_mode<synchronous>, transform_indices = @transform_2, window_bounds = array<i64: 1, 384>}, {pipeline_mode = #tpu.pipeline_mode<synchronous>, transform_indices = @transform_3, window_bounds = array<i64: 128, 128>}, {pipeline_mode = #tpu.pipeline_mode<synchronous>, transform_indices = @transform_4, window_bounds = array<i64: 1, 128>}, {pipeline_mode = #tpu.pipeline_mode<synchronous>, transform_indices = @transform_5, window_bounds = array<i64: 1, 128>}, {pipeline_mode = #tpu.pipeline_mode<synchronous>, transform_indices = @transform_6, window_bounds = array<i64: 1, 128>}, {pipeline_mode = #tpu.pipeline_mode<synchronous>, transform_indices = @transform_7, window_bounds = array<i64: 128, 2048>}, {pipeline_mode = #tpu.pipeline_mode<synchronous>, transform_indices = @transform_8, window_bounds = array<i64: 1, 2048>}, {pipeline_mode = #tpu.pipeline_mode<synchronous>, transform_indices = @transform_9, window_bounds = array<i64: 2048, 128>}, {pipeline_mode = #tpu.pipeline_mode<synchronous>, transform_indices = @transform_10, window_bounds = array<i64: 1, 128>}, {pipeline_mode = #tpu.pipeline_mode<synchronous>, transform_indices = @transform_11, window_bounds = array<i64: 1, 128>}, {pipeline_mode = #tpu.pipeline_mode<synchronous>, transform_indices = @transform_12, window_bounds = array<i64: 1, 128>}, {pipeline_mode = #tpu.pipeline_mode<synchronous>, transform_indices = @transform_13, window_bounds = array<i64: 64, 128>}, {pipeline_mode = #tpu.pipeline_mode<synchronous>, transform_indices = @transform_14, window_bounds = array<i64: 64, 64>}, {transform_indices = @transform_15, window_bounds = array<i64: 16, 128>}]} {
    %c0 = arith.constant 0 : index
    %c0_0 = arith.constant 0 : index
    %0 = vector.load %arg1[%c0, %c0_0] : memref<16x128xf32, #tpu.memory_space<vmem>>, vector<16x128xf32>
    %1 = arith.truncf %0 : vector<16x128xf32> to vector<16x128xbf16>
    %c0_1 = arith.constant 0 : index
    %c0_2 = arith.constant 0 : index
    %2 = vector.load %arg2[%c0_1, %c0_2] : memref<128x384xbf16, #tpu.memory_space<vmem>>, vector<128x384xbf16>
    %cst = arith.constant dense<0.000000e+00> : vector<16x384xf32>
    %3 = tpu.matmul %1, %2, %cst {dimension_numbers = #tpu.dot_dimension_numbers<[1], [0], [0], [1], [0, 0, 1, 1], [], []>} : vector<16x128xbf16>, vector<128x384xbf16>, vector<16x384xf32> -> vector<16x384xf32>
    %c0_3 = arith.constant 0 : index
    %c0_4 = arith.constant 0 : index
    %4 = vector.load %arg3[%c0_3, %c0_4] : memref<1x384xf32, #tpu.memory_space<vmem>>, vector<1x384xf32>
    %5 = vector.broadcast %4 : vector<1x384xf32> to vector<16x384xf32>
    %6 = arith.addf %3, %5 : vector<16x384xf32>
    %7 = vector.extract_strided_slice %6 {offsets = [0, 0], sizes = [16, 128], strides = [1, 1]} : vector<16x384xf32> to vector<16x128xf32>
    %8 = vector.extract_strided_slice %6 {offsets = [0, 128], sizes = [16, 128], strides = [1, 1]} : vector<16x384xf32> to vector<16x128xf32>
    %9 = vector.extract_strided_slice %6 {offsets = [0, 256], sizes = [16, 128], strides = [1, 1]} : vector<16x384xf32> to vector<16x128xf32>
    %10 = vector.shape_cast %7 : vector<16x128xf32> to vector<2x8x128xf32>
    %11 = arith.truncf %10 : vector<2x8x128xf32> to vector<2x8x128xbf16>
    %12 = vector.shape_cast %8 : vector<16x128xf32> to vector<2x8x128xf32>
    %13 = vector.shape_cast %9 : vector<16x128xf32> to vector<2x8x128xf32>
    %c0_5 = arith.constant 0 : index
    %c0_6 = arith.constant 0 : index
    %14 = vector.load %arg14[%c0_5, %c0_6] : memref<64x128xf32, #tpu.memory_space<vmem>>, vector<64x128xf32>
    %15 = tpu.concatenate %12, %12, %12, %12, %12, %12, %12, %12 in 1 : vector<2x8x128xf32>, vector<2x8x128xf32>, vector<2x8x128xf32>, vector<2x8x128xf32>, vector<2x8x128xf32>, vector<2x8x128xf32>, vector<2x8x128xf32>, vector<2x8x128xf32> -> vector<2x64x128xf32>
    %16 = vector.shape_cast %14 : vector<64x128xf32> to vector<1x64x128xf32>
    %17 = vector.broadcast %16 : vector<1x64x128xf32> to vector<2x64x128xf32>
    %18 = arith.mulf %15, %17 : vector<2x64x128xf32>
    %19 = arith.truncf %18 : vector<2x64x128xf32> to vector<2x64x128xbf16>
    %20 = tpu.concatenate %13, %13, %13, %13, %13, %13, %13, %13 in 1 : vector<2x8x128xf32>, vector<2x8x128xf32>, vector<2x8x128xf32>, vector<2x8x128xf32>, vector<2x8x128xf32>, vector<2x8x128xf32>, vector<2x8x128xf32>, vector<2x8x128xf32> -> vector<2x64x128xf32>
    %21 = vector.shape_cast %14 : vector<64x128xf32> to vector<1x64x128xf32>
    %22 = vector.broadcast %21 : vector<1x64x128xf32> to vector<2x64x128xf32>
    %23 = arith.mulf %20, %22 : vector<2x64x128xf32>
    %24 = arith.truncf %23 : vector<2x64x128xf32> to vector<2x64x128xbf16>
    "tpu.trace_start"() <{level = 10 : i32, message = "bqd,bmd->bqm"}> : () -> ()
    %cst_7 = arith.constant dense<0.000000e+00> : vector<2x8x64xf32>
    %25 = tpu.matmul %11, %19, %cst_7 {dimension_numbers = #tpu.dot_dimension_numbers<[2], [2], [1], [1], [0, 0, 0, 1, 1, 1], [0], [0]>} : vector<2x8x128xbf16>, vector<2x64x128xbf16>, vector<2x8x64xf32> -> vector<2x8x64xf32>
    "tpu.trace_stop"() : () -> ()
    %cst_8 = arith.constant 2.500000e-01 : f32
    %26 = vector.broadcast %cst_8 : f32 to vector<2x8x64xf32>
    %27 = arith.mulf %25, %26 : vector<2x8x64xf32>
    %cst_9 = arith.constant dense<0xFF800000> : vector<2x8xf32>
    %28 = vector.multi_reduction <maximumf>, %27, %cst_9 [2] : vector<2x8x64xf32> to vector<2x8xf32>
    %29 = vector.shape_cast %28 : vector<2x8xf32> to vector<2x8x1xf32>
    %30 = vector.broadcast %29 : vector<2x8x1xf32> to vector<2x8x64xf32>
    %31 = arith.subf %27, %30 : vector<2x8x64xf32>
    %32 = math.exp %31 : vector<2x8x64xf32>
    %33 = vector.shape_cast %32 : vector<2x8x64xf32> to vector<16x64xf32>
    %c0_10 = arith.constant 0 : index
    %c0_11 = arith.constant 0 : index
    %34 = vector.load %arg15[%c0_10, %c0_11] : memref<64x64xf32, #tpu.memory_space<vmem>>, vector<64x64xf32>
    %cst_12 = arith.constant dense<0.000000e+00> : vector<16x64xf32>
    %35 = tpu.matmul %33, %34, %cst_12 {dimension_numbers = #tpu.dot_dimension_numbers<[1], [0], [0], [1], [0, 0, 1, 1], [], []>} : vector<16x64xf32>, vector<64x64xf32>, vector<16x64xf32> -> vector<16x64xf32>
    %36 = tpu.reciprocal %35 {approx = true} : vector<16x64xf32> -> vector<16x64xf32>
    %37 = arith.mulf %33, %36 : vector<16x64xf32>
    %38 = vector.shape_cast %37 : vector<16x64xf32> to vector<2x8x64xf32>
    %39 = arith.truncf %38 : vector<2x8x64xf32> to vector<2x8x64xbf16>
    "tpu.trace_start"() <{level = 10 : i32, message = "bqm,bmd->bqd"}> : () -> ()
    %cst_13 = arith.constant dense<0.000000e+00> : vector<2x8x128xf32>
    %40 = tpu.matmul %39, %24, %cst_13 {dimension_numbers = #tpu.dot_dimension_numbers<[2], [1], [1], [2], [0, 0, 0, 1, 1, 2], [0], [0]>} : vector<2x8x64xbf16>, vector<2x64x128xbf16>, vector<2x8x128xf32> -> vector<2x8x128xf32>
    "tpu.trace_stop"() : () -> ()
    %41 = vector.shape_cast %40 : vector<2x8x128xf32> to vector<16x128xf32>
    %42 = arith.truncf %41 : vector<16x128xf32> to vector<16x128xbf16>
    %c0_14 = arith.constant 0 : index
    %c0_15 = arith.constant 0 : index
    %43 = vector.load %arg4[%c0_14, %c0_15] : memref<128x128xbf16, #tpu.memory_space<vmem>>, vector<128x128xbf16>
    %cst_16 = arith.constant dense<0.000000e+00> : vector<16x128xf32>
    %44 = tpu.matmul %42, %43, %cst_16 {dimension_numbers = #tpu.dot_dimension_numbers<[1], [0], [0], [1], [0, 0, 1, 1], [], []>} : vector<16x128xbf16>, vector<128x128xbf16>, vector<16x128xf32> -> vector<16x128xf32>
    %c0_17 = arith.constant 0 : index
    %c0_18 = arith.constant 0 : index
    %45 = vector.load %arg5[%c0_17, %c0_18] : memref<1x128xf32, #tpu.memory_space<vmem>>, vector<1x128xf32>
    %46 = vector.broadcast %45 : vector<1x128xf32> to vector<16x128xf32>
    %47 = arith.addf %44, %46 : vector<16x128xf32>
    %48 = arith.addf %0, %47 : vector<16x128xf32>
    %cst_19 = arith.constant dense<0.000000e+00> : vector<16xf32>
    %49 = vector.multi_reduction <add>, %48, %cst_19 [1] : vector<16x128xf32> to vector<16xf32>
    %50 = vector.shape_cast %49 : vector<16xf32> to vector<16x1xf32>
    %cst_20 = arith.constant 1.280000e+02 : f32
    %51 = vector.broadcast %cst_20 : f32 to vector<16x1xf32>
    %52 = arith.divf %50, %51 : vector<16x1xf32>
    %53 = vector.broadcast %52 : vector<16x1xf32> to vector<16x128xf32>
    %54 = arith.subf %48, %53 : vector<16x128xf32>
    %55 = arith.mulf %54, %54 : vector<16x128xf32>
    %cst_21 = arith.constant dense<0.000000e+00> : vector<16xf32>
    %56 = vector.multi_reduction <add>, %55, %cst_21 [1] : vector<16x128xf32> to vector<16xf32>
    %57 = vector.shape_cast %56 : vector<16xf32> to vector<16x1xf32>
    %cst_22 = arith.constant 1.280000e+02 : f32
    %58 = vector.broadcast %cst_22 : f32 to vector<16x1xf32>
    %59 = arith.divf %57, %58 : vector<16x1xf32>
    %60 = vector.broadcast %52 : vector<16x1xf32> to vector<16x128xf32>
    %61 = arith.subf %48, %60 : vector<16x128xf32>
    %cst_23 = arith.constant 9.99999974E-6 : f32
    %62 = vector.broadcast %cst_23 : f32 to vector<16x1xf32>
    %63 = arith.addf %59, %62 : vector<16x1xf32>
    %64 = math.rsqrt %63 : vector<16x1xf32>
    %65 = vector.broadcast %64 : vector<16x1xf32> to vector<16x128xf32>
    %66 = arith.mulf %61, %65 : vector<16x128xf32>
    %c0_24 = arith.constant 0 : index
    %c0_25 = arith.constant 0 : index
    %67 = vector.load %arg6[%c0_24, %c0_25] : memref<1x128xf32, #tpu.memory_space<vmem>>, vector<1x128xf32>
    %68 = vector.broadcast %67 : vector<1x128xf32> to vector<16x128xf32>
    %69 = arith.mulf %66, %68 : vector<16x128xf32>
    %c0_26 = arith.constant 0 : index
    %c0_27 = arith.constant 0 : index
    %70 = vector.load %arg7[%c0_26, %c0_27] : memref<1x128xf32, #tpu.memory_space<vmem>>, vector<1x128xf32>
    %71 = vector.broadcast %70 : vector<1x128xf32> to vector<16x128xf32>
    %72 = arith.addf %69, %71 : vector<16x128xf32>
    %73 = arith.truncf %72 : vector<16x128xf32> to vector<16x128xbf16>
    %c0_28 = arith.constant 0 : index
    %c0_29 = arith.constant 0 : index
    %74 = vector.load %arg8[%c0_28, %c0_29] : memref<128x2048xbf16, #tpu.memory_space<vmem>>, vector<128x2048xbf16>
    %cst_30 = arith.constant dense<0.000000e+00> : vector<16x2048xf32>
    %75 = tpu.matmul %73, %74, %cst_30 {dimension_numbers = #tpu.dot_dimension_numbers<[1], [0], [0], [1], [0, 0, 1, 1], [], []>} : vector<16x128xbf16>, vector<128x2048xbf16>, vector<16x2048xf32> -> vector<16x2048xf32>
    %c0_31 = arith.constant 0 : index
    %c0_32 = arith.constant 0 : index
    %76 = vector.load %arg9[%c0_31, %c0_32] : memref<1x2048xf32, #tpu.memory_space<vmem>>, vector<1x2048xf32>
    %77 = vector.broadcast %76 : vector<1x2048xf32> to vector<16x2048xf32>
    %78 = arith.addf %75, %77 : vector<16x2048xf32>
    %cst_33 = arith.constant 0.000000e+00 : f32
    %79 = vector.broadcast %cst_33 : f32 to vector<16x2048xf32>
    %80 = arith.maximumf %78, %79 : vector<16x2048xf32>
    %81 = arith.truncf %80 : vector<16x2048xf32> to vector<16x2048xbf16>
    %c0_34 = arith.constant 0 : index
    %c0_35 = arith.constant 0 : index
    %82 = vector.load %arg10[%c0_34, %c0_35] : memref<2048x128xbf16, #tpu.memory_space<vmem>>, vector<2048x128xbf16>
    %cst_36 = arith.constant dense<0.000000e+00> : vector<16x128xf32>
    %83 = tpu.matmul %81, %82, %cst_36 {dimension_numbers = #tpu.dot_dimension_numbers<[1], [0], [0], [1], [0, 0, 1, 1], [], []>} : vector<16x2048xbf16>, vector<2048x128xbf16>, vector<16x128xf32> -> vector<16x128xf32>
    %c0_37 = arith.constant 0 : index
    %c0_38 = arith.constant 0 : index
    %84 = vector.load %arg11[%c0_37, %c0_38] : memref<1x128xf32, #tpu.memory_space<vmem>>, vector<1x128xf32>
    %85 = vector.broadcast %84 : vector<1x128xf32> to vector<16x128xf32>
    %86 = arith.addf %83, %85 : vector<16x128xf32>
    %87 = arith.addf %72, %86 : vector<16x128xf32>
    %cst_39 = arith.constant dense<0.000000e+00> : vector<16xf32>
    %88 = vector.multi_reduction <add>, %87, %cst_39 [1] : vector<16x128xf32> to vector<16xf32>
    %89 = vector.shape_cast %88 : vector<16xf32> to vector<16x1xf32>
    %cst_40 = arith.constant 1.280000e+02 : f32
    %90 = vector.broadcast %cst_40 : f32 to vector<16x1xf32>
    %91 = arith.divf %89, %90 : vector<16x1xf32>
    %92 = vector.broadcast %91 : vector<16x1xf32> to vector<16x128xf32>
    %93 = arith.subf %87, %92 : vector<16x128xf32>
    %94 = arith.mulf %93, %93 : vector<16x128xf32>
    %cst_41 = arith.constant dense<0.000000e+00> : vector<16xf32>
    %95 = vector.multi_reduction <add>, %94, %cst_41 [1] : vector<16x128xf32> to vector<16xf32>
    %96 = vector.shape_cast %95 : vector<16xf32> to vector<16x1xf32>
    %cst_42 = arith.constant 1.280000e+02 : f32
    %97 = vector.broadcast %cst_42 : f32 to vector<16x1xf32>
    %98 = arith.divf %96, %97 : vector<16x1xf32>
    %99 = vector.broadcast %91 : vector<16x1xf32> to vector<16x128xf32>
    %100 = arith.subf %87, %99 : vector<16x128xf32>
    %cst_43 = arith.constant 9.99999974E-6 : f32
    %101 = vector.broadcast %cst_43 : f32 to vector<16x1xf32>
    %102 = arith.addf %98, %101 : vector<16x1xf32>
    %103 = math.rsqrt %102 : vector<16x1xf32>
    %104 = vector.broadcast %103 : vector<16x1xf32> to vector<16x128xf32>
    %105 = arith.mulf %100, %104 : vector<16x128xf32>
    %c0_44 = arith.constant 0 : index
    %c0_45 = arith.constant 0 : index
    %106 = vector.load %arg12[%c0_44, %c0_45] : memref<1x128xf32, #tpu.memory_space<vmem>>, vector<1x128xf32>
    %107 = vector.broadcast %106 : vector<1x128xf32> to vector<16x128xf32>
    %108 = arith.mulf %105, %107 : vector<16x128xf32>
    %c0_46 = arith.constant 0 : index
    %c0_47 = arith.constant 0 : index
    %109 = vector.load %arg13[%c0_46, %c0_47] : memref<1x128xf32, #tpu.memory_space<vmem>>, vector<1x128xf32>
    %110 = vector.broadcast %109 : vector<1x128xf32> to vector<16x128xf32>
    %111 = arith.addf %108, %110 : vector<16x128xf32>
    %c0_48 = arith.constant 0 : index
    %c0_49 = arith.constant 0 : index
    %112 = vector.load %arg16[%c0_48, %c0_49] : memref<16x128xf32, #tpu.memory_space<vmem>>, vector<16x128xf32>
    tpu.vector_store %arg16[%c0_48, %c0_49], %111 {strides = array<i32>} : memref<16x128xf32, #tpu.memory_space<vmem>>, vector<16x128xf32>,
    return
  }
  func.func @transform_0(%arg0: i32) -> (i32, i32) {
    %c0_i32 = arith.constant 0 : i32
    %c0_i32_0 = arith.constant 0 : i32
    return %arg0, %c0_i32 : i32, i32
  }
  func.func @transform_1(%arg0: i32) -> (i32, i32) {
    %c0_i32 = arith.constant 0 : i32
    %c0_i32_0 = arith.constant 0 : i32
    %c0_i32_1 = arith.constant 0 : i32
    return %c0_i32, %c0_i32_0 : i32, i32
  }
  func.func @transform_2(%arg0: i32) -> (i32, i32) {
    %c0_i32 = arith.constant 0 : i32
    %c0_i32_0 = arith.constant 0 : i32
    %c0_i32_1 = arith.constant 0 : i32
    return %c0_i32, %c0_i32_0 : i32, i32
  }
  func.func @transform_3(%arg0: i32) -> (i32, i32) {
    %c0_i32 = arith.constant 0 : i32
    %c0_i32_0 = arith.constant 0 : i32
    %c0_i32_1 = arith.constant 0 : i32
    return %c0_i32, %c0_i32_0 : i32, i32
  }
  func.func @transform_4(%arg0: i32) -> (i32, i32) {
    %c0_i32 = arith.constant 0 : i32
    %c0_i32_0 = arith.constant 0 : i32
    %c0_i32_1 = arith.constant 0 : i32
    return %c0_i32, %c0_i32_0 : i32, i32
  }
  func.func @transform_5(%arg0: i32) -> (i32, i32) {
    %c0_i32 = arith.constant 0 : i32
    %c0_i32_0 = arith.constant 0 : i32
    %c0_i32_1 = arith.constant 0 : i32
    return %c0_i32, %c0_i32_0 : i32, i32
  }
  func.func @transform_6(%arg0: i32) -> (i32, i32) {
    %c0_i32 = arith.constant 0 : i32
    %c0_i32_0 = arith.constant 0 : i32
    %c0_i32_1 = arith.constant 0 : i32
    return %c0_i32, %c0_i32_0 : i32, i32
  }
  func.func @transform_7(%arg0: i32) -> (i32, i32) {
    %c0_i32 = arith.constant 0 : i32
    %c0_i32_0 = arith.constant 0 : i32
    %c0_i32_1 = arith.constant 0 : i32
    return %c0_i32, %c0_i32_0 : i32, i32
  }
  func.func @transform_8(%arg0: i32) -> (i32, i32) {
    %c0_i32 = arith.constant 0 : i32
    %c0_i32_0 = arith.constant 0 : i32
    %c0_i32_1 = arith.constant 0 : i32
    return %c0_i32, %c0_i32_0 : i32, i32
  }
  func.func @transform_9(%arg0: i32) -> (i32, i32) {
    %c0_i32 = arith.constant 0 : i32
    %c0_i32_0 = arith.constant 0 : i32
    %c0_i32_1 = arith.constant 0 : i32
    return %c0_i32, %c0_i32_0 : i32, i32
  }
  func.func @transform_10(%arg0: i32) -> (i32, i32) {
    %c0_i32 = arith.constant 0 : i32
    %c0_i32_0 = arith.constant 0 : i32
    %c0_i32_1 = arith.constant 0 : i32
    return %c0_i32, %c0_i32_0 : i32, i32
  }
  func.func @transform_11(%arg0: i32) -> (i32, i32) {
    %c0_i32 = arith.constant 0 : i32
    %c0_i32_0 = arith.constant 0 : i32
    %c0_i32_1 = arith.constant 0 : i32
    return %c0_i32, %c0_i32_0 : i32, i32
  }
  func.func @transform_12(%arg0: i32) -> (i32, i32) {
    %c0_i32 = arith.constant 0 : i32
    %c0_i32_0 = arith.constant 0 : i32
    %c0_i32_1 = arith.constant 0 : i32
    return %c0_i32, %c0_i32_0 : i32, i32
  }
  func.func @transform_13(%arg0: i32) -> (i32, i32) {
    %c0_i32 = arith.constant 0 : i32
    %c0_i32_0 = arith.constant 0 : i32
    %c0_i32_1 = arith.constant 0 : i32
    return %c0_i32, %c0_i32_0 : i32, i32
  }
  func.func @transform_14(%arg0: i32) -> (i32, i32) {
    %c0_i32 = arith.constant 0 : i32
    %c0_i32_0 = arith.constant 0 : i32
    %c0_i32_1 = arith.constant 0 : i32
    return %c0_i32, %c0_i32_0 : i32, i32
  }
  func.func @transform_15(%arg0: i32) -> (i32, i32) {
    %c0_i32 = arith.constant 0 : i32
    %c0_i32_0 = arith.constant 0 : i32
    return %arg0, %c0_i32 : i32, i32
  }
}

</mosaic_0001>

<bundles_post_ra>
// kernel: tpu_custom_call.1
= control target key start
LH: loop header
LB: loop body
LE: loop exit
PB: predicated region body
PF: predicated region fallthrough
CT: control target
= control target key end

     0   :  { %20 = vsyncpa [#allocation3], 0  ;;  %s5065_s0 = inlined_call_operand.hbm [shape: f32[16,128], index: 0, kind: input, shape index: {}]   ;;  %s5066_s1 = inlined_call_operand.hbm [shape: bf16[128,384], index: 1, kind: input, shape index: {}]   ;;  %s5067_s2 = inlined_call_operand.vmem [shape: f32[1,384], index: 2, kind: input, shape index: {}]   ;;  %s5068_s3 = inlined_call_operand.hbm [shape: bf16[128,128], index: 3, kind: input, shape index: {}]   ;;  %s5069_s4 = inlined_call_operand.vmem [shape: f32[1,128], index: 4, kind: input, shape index: {}]   ;;  %s5070_s5 = inlined_call_operand.vmem [shape: f32[1,128], index: 5, kind: input, shape index: {}]   ;;  %s5071_s6 = inlined_call_operand.vmem [shape: f32[1,128], index: 6, kind: input, shape index: {}]   ;;  %s5072_s7 = inlined_call_operand.hbm [shape: bf16[128,2048], index: 7, kind: input, shape index: {}]   ;;  %s5073_s8 = inlined_call_operand.vmem [shape: f32[1,2048], index: 8, kind: input, shape index: {}]   ;;  %s5074_s9 = inlined_call_operand.hbm [shape: bf16[2048,128], index: 9, kind: input, shape index: {}]   ;;  %s5075_s10 = inlined_call_operand.vmem [shape: f32[1,128], index: 10, kind: input, shape index: {}]   ;;  %s5076_s11 = inlined_call_operand.vmem [shape: f32[1,128], index: 11, kind: input, shape index: {}]   ;;  %s5077_s12 = inlined_call_operand.vmem [shape: f32[1,128], index: 12, kind: input, shape index: {}]   ;;  %s5078_s13 = inlined_call_operand.hbm [shape: f32[64,128], index: 13, kind: input, shape index: {}]   ;;  %s5079_s14 = inlined_call_operand.hbm [shape: f32[64,64], index: 14, kind: input, shape index: {}]   ;;  %s5080_s15 = inlined_call_operand.hbm [shape: f32[16,128], index: 15, kind: output, shape index: {}]  }
   0x1   :  { %21 = vsyncpa [#allocation6], 0 }
   0x2   :  { %22 = vsyncpa [#allocation9], 0 }
   0x3   :  { %23 = vsyncpa [#allocation12], 0 }
   0x4   :  { %24 = vsyncpa [#allocation4], 0  ;;  %s4602_s18 = smov [#allocation5]   ;;  %s4416_s22 = scalar_lea.hbm %s5066_s1, 3072 }
   0x5   :  { %s42_s19 = sshll.u32 %s4602_s18, 4  ;;  %p4417_p0 = scmp.ne.s32.totalorder %s5066_s1, %s4416_s22  ;;  %s43_s19 = int_to_ptr.vmem [resolvable:$true] %s42_s19 }
   0x6   :  { %p4420_p1 = scmp.lt.u32.totalorder %s4416_s22, %s5066_s1 }
   0x8   :  { %p4422_p2 = pnand %p4420_p1, %p4417_p0 }
   0xa   :  { %4425 = shalt.err (!%p4422_p2)
}
   0xb   :  { %s4426_s27 = scalar_lea.vmem %s43_s19, 3072  ;;  %p4431_p4 = scmp.lt.s32.totalorder %s43_s19, %s43_s19 }
   0xc   :  { %p4427_p3 = scmp.ne.s32.totalorder %s43_s19, %s4426_s27  ;;  %p4432_p5 = scmp.lt.s32.totalorder %s4426_s27, %s4426_s27 }
   0xe   :  { %p4433_p6 = por %p4432_p5, %p4431_p4 }
  0x10   :  { %p4434_p7 = pnand %p4433_p6, %p4427_p3 }
  0x12   :  { %4437 = shalt.err (!%p4434_p7)
}
  0x13   :  { %s4603_s28 = smov 192   ;;  %s4604_s29 = smov 12  }
  0x14   :  { %48 = dma.hbm_to_vmem [thread:$0]  %s5066_s1, 3072, %s43_s19, [#allocation6], %s4603_s28, %s4603_s28, %s4604_s29  }
  0x15   :  { %s4605_s17 = smov [#allocation8]   ;;  %s4438_s22 = scalar_lea.hbm %s5072_s7, 16384 }
  0x16   :  { %s74_s18 = sshll.u32 %s4605_s17, 4  ;;  %p4439_p8 = scmp.ne.s32.totalorder %s5072_s7, %s4438_s22  ;;  %s75_s18 = int_to_ptr.vmem [resolvable:$true] %s74_s18 }
  0x17   :  { %p4442_p9 = scmp.lt.u32.totalorder %s4438_s22, %s5072_s7 }
  0x19   :  { %p4444_p10 = pnand %p4442_p9, %p4439_p8 }
  0x1b   :  { %4447 = shalt.err (!%p4444_p10)
}
  0x1c   :  { %s4448_s27 = scalar_lea.vmem %s75_s18, 16384  ;;  %p4453_p12 = scmp.lt.s32.totalorder %s75_s18, %s75_s18 }
  0x1d   :  { %p4449_p11 = scmp.ne.s32.totalorder %s75_s18, %s4448_s27  ;;  %p4454_p13 = scmp.lt.s32.totalorder %s4448_s27, %s4448_s27 }
  0x1f   :  { %p4455_p0 = por %p4454_p13, %p4453_p12 }
  0x21   :  { %p4456_p1 = pnand %p4455_p0, %p4449_p11 }
  0x23   :  { %4459 = shalt.err (!%p4456_p1)
}
  0x24   :  { %s4606_s1 = smov 1024   ;;  %s4607_s19 = smov 64  }
  0x25   :  { %80 = dma.hbm_to_vmem [thread:$0]  %s5072_s7, 16384, %s75_s18, [#allocation9], %s4606_s1, %s4606_s1, %s4607_s19  }
  0x26   :  { %s4608_s30 = smov [#allocation11]   ;;  %s4609_s17 = smov [#allocation2]  }
  0x27   :  { %s106_s16 = sshll.u32 %s4608_s30, 4  ;;  %s30_s20 = sshll.u32 %s4609_s17, 4  ;;  %s107_s16 = int_to_ptr.vmem [resolvable:$true] %s106_s16  ;;  %s4725_s20 = int_to_ptr.vmem [resolvable:$true] %s30_s20 }
  0x28   :  { %s4460_s23 = scalar_lea.hbm %s5078_s13, 1024 }
  0x29   :  { %p4461_p2 = scmp.ne.s32.totalorder %s5078_s13, %s4460_s23  ;;  %p4464_p3 = scmp.lt.u32.totalorder %s4460_s23, %s5078_s13 }
  0x2b   :  { %p4466_p4 = pnand %p4464_p3, %p4461_p2 }
  0x2d   :  { %4469 = shalt.err (!%p4466_p4)
}
  0x2e   :  { %s4470_s7 = scalar_lea.vmem %s107_s16, 1024  ;;  %p4475_p6 = scmp.lt.s32.totalorder %s107_s16, %s107_s16 }
  0x2f   :  { %p4471_p5 = scmp.ne.s32.totalorder %s107_s16, %s4470_s7  ;;  %p4476_p7 = scmp.lt.s32.totalorder %s4470_s7, %s4470_s7 }
  0x31   :  { %p4477_p8 = por %p4476_p7, %p4475_p6 }
  0x33   :  { %p4478_p9 = pnand %p4477_p8, %p4471_p5 }
  0x35   :  { %4481 = shalt.err (!%p4478_p9)
}
  0x36   :  { %s4610_s18 = smov 128   ;;  %s4611_s1 = smov 8  }
  0x37   :  { %112 = dma.hbm_to_vmem [thread:$0]  %s5078_s13, 1024, %s107_s16, [#allocation12], %s4610_s18, %s4610_s18, %s4611_s1  }
  0x38   :  { %s4482_s21 = scalar_lea.hbm %s5065_s0, 256 }
  0x39   :  { %p4483_p10 = scmp.ne.s32.totalorder %s5065_s0, %s4482_s21  ;;  %p4486_p11 = scmp.lt.u32.totalorder %s4482_s21, %s5065_s0 }
  0x3b   :  { %p4488_p12 = pnand %p4486_p11, %p4483_p10 }
  0x3d   :  { %4491 = shalt.err (!%p4488_p12)
}
  0x3e   :  { %s4492_s26 = scalar_lea.vmem %s4725_s20, 256  ;;  %p4497_p0 = scmp.lt.s32.totalorder %s4725_s20, %s4725_s20 }
  0x3f   :  { %p4493_p13 = scmp.ne.s32.totalorder %s4725_s20, %s4492_s26  ;;  %p4498_p1 = scmp.lt.s32.totalorder %s4492_s26, %s4492_s26 }
  0x41   :  { %p4499_p2 = por %p4498_p1, %p4497_p0 }
  0x43   :  { %p4500_p3 = pnand %p4499_p2, %p4493_p13 }
  0x45   :  { %4503 = shalt.err (!%p4500_p3)
}
  0x46   :  { %36 = dma.hbm_to_vmem [thread:$0]  %s5065_s0, 256, %s4725_s20, [#allocation3], %s4610_s18, %s4610_s18, %s4611_s1  }
  0x47   :  { %s4612_s27 = smov [#allocation7]   ;;  %s4613_s28 = smov [#allocation10]  }
  0x48   :  { %s56_s7 = sshll.u32 %s4612_s27, 4  ;;  %s88_s29 = sshll.u32 %s4613_s28, 4  ;;  %s57_s7 = int_to_ptr.vmem [resolvable:$true] %s56_s7  ;;  %s89_s29 = int_to_ptr.vmem [resolvable:$true] %s88_s29 }
  0x49   :  { %s4504_s21 = scalar_lea.hbm %s5068_s3, 1024 }
  0x4a   :  { %p4505_p4 = scmp.ne.s32.totalorder %s5068_s3, %s4504_s21  ;;  %p4508_p5 = scmp.lt.u32.totalorder %s4504_s21, %s5068_s3 }
  0x4c   :  { %p4510_p6 = pnand %p4508_p5, %p4505_p4 }
  0x4e   :  { %4513 = shalt.err (!%p4510_p6)
}
  0x4f   :  { %s4514_s0 = scalar_lea.vmem %s57_s7, 1024  ;;  %p4519_p8 = scmp.lt.s32.totalorder %s57_s7, %s57_s7 }
  0x50   :  { %p4515_p7 = scmp.ne.s32.totalorder %s57_s7, %s4514_s0  ;;  %p4520_p9 = scmp.lt.s32.totalorder %s4514_s0, %s4514_s0 }
  0x52   :  { %p4521_p10 = por %p4520_p9, %p4519_p8 }
  0x54   :  { %p4522_p11 = pnand %p4521_p10, %p4515_p7 }
  0x56   :  { %4525 = shalt.err (!%p4522_p11)
}
  0x57   :  { %s4614_s20 = smov 4   ;;  %s4526_s28 = scalar_lea.hbm %s5074_s9, 16384 }
  0x58   :  { %62 = dma.hbm_to_vmem [thread:$0]  %s5068_s3, 1024, %s57_s7, [#allocation6], %s4607_s19, %s4607_s19, %s4614_s20  }
  0x59   :  { %p4527_p12 = scmp.ne.s32.totalorder %s5074_s9, %s4526_s28  ;;  %p4530_p13 = scmp.lt.u32.totalorder %s4526_s28, %s5074_s9 }
  0x5b   :  { %p4532_p0 = pnand %p4530_p13, %p4527_p12 }
  0x5d   :  { %4535 = shalt.err (!%p4532_p0)
}
  0x5e   :  { %s4536_s23 = scalar_lea.vmem %s89_s29, 16384  ;;  %p4541_p2 = scmp.lt.s32.totalorder %s89_s29, %s89_s29 }
  0x5f   :  { %p4537_p1 = scmp.ne.s32.totalorder %s89_s29, %s4536_s23  ;;  %p4542_p3 = scmp.lt.s32.totalorder %s4536_s23, %s4536_s23 }
  0x61   :  { %p4543_p4 = por %p4542_p3, %p4541_p2 }
  0x63   :  { %p4544_p5 = pnand %p4543_p4, %p4537_p1 }
  0x65   :  { %4547 = shalt.err (!%p4544_p5)
}
  0x66   :  { %94 = dma.hbm_to_vmem [thread:$0]  %s5074_s9, 16384, %s89_s29, [#allocation9], %s4607_s19, %s4607_s19, %s4614_s20  }
  0x67   :  { %s4615_s24 = smov [#allocation13]   ;;  %s4548_s13 = scalar_lea.hbm %s5079_s14, 1024 }
  0x68   :  { %s118_s25 = sshll.u32 %s4615_s24, 4  ;;  %p4549_p6 = scmp.ne.s32.totalorder %s5079_s14, %s4548_s13  ;;  %s119_s25 = int_to_ptr.vmem [resolvable:$true] %s118_s25 }
  0x69   :  { %p4552_p7 = scmp.lt.u32.totalorder %s4548_s13, %s5079_s14 }
  0x6b   :  { %p4554_p8 = pnand %p4552_p7, %p4549_p6 }
  0x6d   :  { %4557 = shalt.err (!%p4554_p8)
}
  0x6e   :  { %s4558_s17 = scalar_lea.vmem %s119_s25, 1024  ;;  %p4563_p10 = scmp.lt.s32.totalorder %s119_s25, %s119_s25 }
  0x6f   :  { %p4559_p9 = scmp.ne.s32.totalorder %s119_s25, %s4558_s17  ;;  %p4564_p11 = scmp.lt.s32.totalorder %s4558_s17, %s4558_s17 }
  0x71   :  { %p4565_p12 = por %p4564_p11, %p4563_p10 }
  0x73   :  { %p4566_p13 = pnand %p4565_p12, %p4559_p9 }
  0x75   :  { %4569 = shalt.err (!%p4566_p13)
}
  0x76   :  { %124 = dma.hbm_to_vmem [thread:$0]  %s5079_s14, 1024, %s119_s25, [#allocation12], %s4610_s18, %s4610_s18, %s4611_s1  }
  0x77   :  { %4592 = dma.done.wait [#allocation3], 256  }
  0x78   :  { %4593 = vsyncadd [#allocation3], 4294967040 }
  0x79   :  { %4594 = dma.done.wait [#allocation6], 4096  }
  0x7a   :  { %4595 = vsyncadd [#allocation6], 4294963200 }
  0x7b   :  { %4596 = dma.done.wait [#allocation9], 32768  }
  0x7c   :  { %4597 = vsyncadd [#allocation9], 4294934528 }
  0x7d   :  { %4598 = dma.done.wait [#allocation12], 2048  }
  0x7e   :  { %4599 = vsyncadd [#allocation12], 4294965248  ;;  %v4616_v0 = vmov 0   ;;  %v4617_v1 = vmov 0.0   ;;  %vm4618_vm0 = vmmov 0   ;;  %v4812_v23 = vld [vmem:[#allocation2] sm:$0xff]  ;;  %v184_v29 = vlaneseq }
  0x7f   :  { %359 = vmatprep.mubr.bf16.mxu0 %v4616_v0  ;;  %4091 = vmatprep.subr.bf16.mxu1 %v4617_v1  ;;  %v4232_v2 = vld [vmem:[#allocation5 + $0x4] ss:$12 sps:$4 sm:$0xff]   ;;  %v4234_v3 = vld [vmem:[#allocation5] ss:$12 sps:$4 sm:$0xff]   ;;  %v4235_v4 = vld [vmem:[#allocation5 + $0x1c] ss:$12 sps:$4 sm:$0xff]  }
  0x80   :  { %4107 = vmatprep.mubr.msk.bf16.mxu1 %vm4618_vm0, %v4617_v1  ;;  %327 = vmatprep.subr.bf16.mxu0 %v4232_v2  ;;  %v4237_v5 = vld [vmem:[#allocation5 + $0x18] ss:$12 sps:$4 sm:$0xff]   ;;  %v4238_v6 = vld [vmem:[#allocation5 + $0x34] ss:$12 sps:$4 sm:$0xff]   ;;  %v4240_v7 = vld [vmem:[#allocation5 + $0x30] ss:$12 sps:$4 sm:$0xff]  }
  0x81   :  { %328 = vmatpush1.bf16.msra.mxu0 %v4234_v3  ;;  %v4241_v8 = vld [vmem:[#allocation5 + $0x4c] ss:$12 sps:$4 sm:$0xff]   ;;  %v4243_v9 = vld [vmem:[#allocation5 + $0x48] ss:$12 sps:$4 sm:$0xff]   ;;  %v4244_v10 = vld [vmem:[#allocation5 + $0x64] ss:$12 sps:$4 sm:$0xff]  }
  0x82   :  { %329 = vmatprep.subr.bf16.mxu0 %v4235_v4  ;;  %v4256_v11 = vld [vmem:[#allocation5 + $0x8] ss:$12 sps:$4 sm:$0xff]   ;;  %v4257_v12 = vld [vmem:[#allocation5 + $0x20] ss:$12 sps:$4 sm:$0xff]   ;;  %v4258_v15 = vld [vmem:[#allocation5 + $0x38] ss:$12 sps:$4 sm:$0xff]  }
  0x83   :  { %4092 = vmatpush3.bf16.msra.mxu1 %v4256_v11  ;;  %v4246_v13 = vld [vmem:[#allocation5 + $0x60] ss:$12 sps:$4 sm:$0xff]   ;;  %v4247_v14 = vld [vmem:[#allocation5 + $0x7c] ss:$12 sps:$4 sm:$0xff]   ;;  %v4249_v16 = vld [vmem:[#allocation5 + $0x78] ss:$12 sps:$4 sm:$0xff]  }
  0x84   :  { %4093 = vmatprep.subr.bf16.mxu1 %v4617_v1  ;;  %v4250_v17 = vld [vmem:[#allocation5 + $0x94] ss:$12 sps:$4 sm:$0xff]   ;;  %v4259_v18 = vld [vmem:[#allocation5 + $0x50] ss:$12 sps:$4 sm:$0xff]   ;;  %v4253_v20 = vld [vmem:[#allocation5 + $0xac] ss:$12 sps:$4 sm:$0xff]  }
  0x85   :  { %330 = vmatpush1.bf16.msra.mxu0 %v4237_v5  ;;  %v4252_v19 = vld [vmem:[#allocation5 + $0x90] ss:$12 sps:$4 sm:$0xff]   ;;  %v4260_v21 = vld [vmem:[#allocation5 + $0x68] ss:$12 sps:$4 sm:$0xff]   ;;  %v4261_v25 = vld [vmem:[#allocation5 + $0x80] ss:$12 sps:$4 sm:$0xff]  }
  0x86   :  { %331 = vmatprep.subr.bf16.mxu0 %v4238_v6  ;;  %v4255_v22 = vld [vmem:[#allocation5 + $0xa8] ss:$12 sps:$4 sm:$0xff]   ;;  %v4814_v24 = vld [vmem:[#allocation2 + $0x8] sm:$0xff]  ;;  %v4828_v30 = vshrl.u32 %v184_v29, 7  ;;  %v182_v32 = vld [vmem:[%s5067_s2] sm:$0x7] }
  0x87   :  { %4094 = vmatpush3.bf16.msra.mxu1 %v4257_v12  ;;  %v149_v26 = vpack.c.bf16 %v4814_v24, %v4812_v23  ;;  %v4262_v27 = vld [vmem:[#allocation5 + $0x98] ss:$12 sps:$4 sm:$0xff]   ;;  %v4263_v28 = vld [vmem:[#allocation5 + $0xb0] ss:$12 sps:$4 sm:$0xff]   ;;  %v4839_v37 = vld [vmem:[#allocation11 + $0x8] sm:$0xff]  ;;  %vm551_vm1 = vcmask 523264  }
  0x88   :  { %4095 = vmatprep.subr.bf16.mxu1 %v4617_v1  ;;  %v4831_v31 = vsub.s32 1, %v4828_v30  ;;  %v4837_v36 = vld [vmem:[#allocation11] sm:$0xff]  ;;  %v4845_v47 = vld [vmem:[#allocation11 + $0x10] sm:$0xff]  ;;  %v4847_v48 = vld [vmem:[#allocation11 + $0x18] sm:$0xff]  ;;  %v4850_v50 = vsub.s32 2, %v4828_v30  ;;  %v4876_v11 = vsub.s32 0, %v4828_v30 }
  0x89   :  { %332 = vmatpush1.bf16.msra.mxu0 %v4240_v7  ;;  %v4861_v62 = vld [vmem:[#allocation11 + $0x20] sm:$0xff]  ;;  %v4863_v63 = vld [vmem:[#allocation11 + $0x28] sm:$0xff]  ;;  %s4619_s13 = smov [#allocation14]  }
  0x8a   :  { %333 = vmatprep.subr.bf16.mxu0 %v4241_v8  ;;  %v191_v33 = vrot.slane %v182_v32, %v4831_v31  ;;  %v195_v56 = vrot.slane %v182_v32, %v4850_v50  ;;  %v4871_v8 = vld [vmem:[#allocation11 + $0x30] sm:$0xff]  ;;  %s3554_s16 = sshll.u32 %s4619_s13, 4  ;;  %s3555_s16 = int_to_ptr.vmem [resolvable:$true] %s3554_s16 }
  0x8b   :  { %4096 = vmatpush3.bf16.msra.mxu1 %v4258_v15  ;;  %s4570_s27 = scalar_lea.vmem %s3555_s16, 256  ;;  %p4575_p1 = scmp.lt.s32.totalorder %s3555_s16, %s3555_s16 }
  0x8c   :  { %4097 = vmatprep.subr.bf16.mxu1 %v4617_v1  ;;  %p4571_p0 = scmp.ne.s32.totalorder %s3555_s16, %s4570_s27  ;;  %p4576_p2 = scmp.lt.s32.totalorder %s4570_s27, %s4570_s27 }
  0x8d   :  { %334 = vmatpush1.bf16.msra.mxu0 %v4243_v9  ;;  %v4873_v9 = vld [vmem:[#allocation11 + $0x38] sm:$0xff] }
  0x8e   :  { %335 = vmatprep.subr.bf16.mxu0 %v4244_v10  ;;  %p4577_p3 = por %p4576_p2, %p4575_p1 }
  0x8f   :  { %4098 = vmatpush3.bf16.msra.mxu1 %v4259_v18 }
  0x90   :  { %4099 = vmatprep.subr.bf16.mxu1 %v4617_v1  ;;  %p4578_p4 = pnand %p4577_p3, %p4571_p0 }
  0x91   :  { %336 = vmatpush1.bf16.msra.mxu0 %v4246_v13 }
  0x92   :  { %337 = vmatprep.subr.bf16.mxu0 %v4247_v14 }
  0x93   :  { %4100 = vmatpush3.bf16.msra.mxu1 %v4260_v21 }
  0x94   :  { %4101 = vmatprep.subr.bf16.mxu1 %v4617_v1 }
  0x95   :  { %338 = vmatpush1.bf16.msra.mxu0 %v4249_v16  ;;  %v187_v16 = vrot.slane %v182_v32, %v4876_v11 }
  0x96   :  { %339 = vmatprep.subr.bf16.mxu0 %v4250_v17 }
  0x97   :  { %4102 = vmatpush3.bf16.msra.mxu1 %v4261_v25 }
  0x98   :  { %4103 = vmatprep.subr.bf16.mxu1 %v4617_v1 }
  0x99   :  { %340 = vmatpush1.bf16.msra.mxu0 %v4252_v19 }
  0x9a   :  { %341 = vmatprep.subr.bf16.mxu0 %v4253_v20 }
  0x9b   :  { %4104 = vmatpush3.bf16.msra.mxu1 %v4262_v27 }
  0x9c   :  { %4105 = vmatprep.subr.bf16.mxu1 %v4617_v1 }
  0x9d   :  { %342 = vmatpush1.bf16.msra.mxu0 %v4255_v22 }
  0x9e   :  { %4111 = vmatprep.subr.bf16.mxu0 %v4617_v1 }
  0x9f   :  { %4106 = vmatpush3.bf16.msra.mxu1 %v4263_v28 }
  0xa0   :  { %360 = vmatmul.mubr.bf16.vlgmr.msra.gmra.mrb[0].mxu0 %v149_v26  ;;  %4123 = vmatprep.subr.bf16.mxu1 %v4617_v1 }
  0xa1   :  { %4119 = vmatprep.mubr.msk.bf16.mxu0 %vm4618_vm0, %v4617_v1 }
  0xa2   :  { %4108 = vmatmul.mubr.bf16.vlgmr.msra.gmra.mrb[0].mxu1 %v149_v26 }
  0xa3   :  { %4131 = vmatprep.mubr.msk.bf16.mxu1 %vm4618_vm0, %v4617_v1 }
 0x173   :  { %v361_v34 = vpop.f32.mrb[0].mxu0 }
 0x174   :  { %v363_v35 = vpop.f32.mrb[1].mxu0  ;;  %v362_v20 = vadd.f32 %v361_v34, %v187_v16 }
 0x175   :  { %v364_v38 = vadd.f32 %v363_v35, %v191_v33  ;;  %v365_v39 = vpop.f32.mrb[2].mxu0  ;;  %v404_v53 = vpop.f32.mrb[0].mxu1 }
 0x176   :  { %v367_v40 = vpop.f32.mrb[3].mxu0  ;;  %v4109_v57 = vpop.f32.mrb[1].mxu1  ;;  %v405_v18 = vadd.f32 %v404_v53, %v195_v56  ;;  %v366_v25 = vadd.f32 %v365_v39, %v187_v16  ;;  %v411_v26 = vpack.c.bf16 %v362_v20, %v362_v20 }
 0x177   :  { %v368_v41 = vadd.f32 %v367_v40, %v191_v33  ;;  %v421_v42 = vmul.f32 %v4837_v36, %v364_v38  ;;  %v422_v43 = vmul.f32 %v4839_v37, %v364_v38  ;;  %v423_v51 = vmul.f32 %v4845_v47, %v364_v38  ;;  %v407_v58 = vpop.f32.mrb[2].mxu1  ;;  %v564_v57 = vld [vmem:[#allocation13] sm:$0xff] }
 0x178   :  { %v424_v52 = vmul.f32 %v4847_v48, %v364_v38  ;;  %v4859_v60 = vadd.f32 %v407_v58, %v195_v56  ;;  %v4110_v61 = vpop.f32.mrb[3].mxu1  ;;  %v425_v3 = vmul.f32 %v4861_v62, %v364_v38  ;;  %v426_v4 = vmul.f32 %v4863_v63, %v364_v38  ;;  %v565_v58 = vld [vmem:[#allocation13 + $0x8] sm:$0xff] }
 0x179   :  { %v437_v44 = vpack.c.bf16 %v422_v43, %v421_v42  ;;  %v429_v45 = vmul.f32 %v4837_v36, %v368_v41  ;;  %v430_v46 = vmul.f32 %v4839_v37, %v368_v41  ;;  %v431_v54 = vmul.f32 %v4845_v47, %v368_v41  ;;  %v566_v61 = vld [vmem:[#allocation13 + $0x10] sm:$0xff] }
 0x17a   :  { %v432_v55 = vmul.f32 %v4847_v48, %v368_v41  ;;  %v438_v59 = vpack.c.bf16 %v424_v52, %v423_v51  ;;  %v433_v5 = vmul.f32 %v4861_v62, %v368_v41  ;;  %v434_v6 = vmul.f32 %v4863_v63, %v368_v41 }
 0x17b   :  { %4112 = vmatpush3.bf16.xpose.msra.mxu0 %v437_v44  ;;  %v441_v49 = vpack.c.bf16 %v430_v46, %v429_v45  ;;  %v439_v7 = vpack.c.bf16 %v426_v4, %v425_v3  ;;  %v427_v12 = vmul.f32 %v4871_v8, %v364_v38  ;;  %v428_v13 = vmul.f32 %v4873_v9, %v364_v38  ;;  %v568_v4 = vld [vmem:[#allocation13 + $0x20] sm:$0xff] }
 0x17c   :  { %4113 = vmatprep.subr.bf16.mxu0 %v4617_v1  ;;  %v442_v2 = vpack.c.bf16 %v432_v55, %v431_v54  ;;  %v443_v10 = vpack.c.bf16 %v434_v6, %v433_v5  ;;  %v435_v14 = vmul.f32 %v4871_v8, %v368_v41  ;;  %v436_v15 = vmul.f32 %v4873_v9, %v368_v41  ;;  %v569_v5 = vld [vmem:[#allocation13 + $0x28] sm:$0xff] }
 0x17d   :  { %4124 = vmatpush3.bf16.xpose.msra.mxu1 %v441_v49  ;;  %v440_v17 = vpack.c.bf16 %v428_v13, %v427_v12  ;;  %v445_v21 = vmul.f32 %v4837_v36, %v405_v18  ;;  %v446_v22 = vmul.f32 %v4839_v37, %v405_v18  ;;  %v447_v28 = vmul.f32 %v4845_v47, %v405_v18 }
 0x17e   :  { %4125 = vmatprep.subr.bf16.mxu1 %v4617_v1  ;;  %v444_v19 = vpack.c.bf16 %v436_v15, %v435_v14  ;;  %v448_v29 = vmul.f32 %v4847_v48, %v405_v18  ;;  %v412_v32 = vpack.c.bf16 %v366_v25, %v366_v25  ;;  %v449_v34 = vmul.f32 %v4861_v62, %v405_v18 }
 0x17f   :  { %v461_v27 = vpack.c.bf16 %v446_v22, %v445_v21  ;;  %v450_v35 = vmul.f32 %v4863_v63, %v405_v18  ;;  %v451_v39 = vmul.f32 %v4871_v8, %v405_v18  ;;  %v452_v40 = vmul.f32 %v4873_v9, %v405_v18 }
 0x180   :  { %v462_v33 = vpack.c.bf16 %v448_v29, %v447_v28  ;;  %v4206_v6 = vpack.c.bf16 %v569_v5, %v568_v4  ;;  %v453_v20 = vmul.f32 %v4837_v36, %v4859_v60  ;;  %v454_v21 = vmul.f32 %v4839_v37, %v4859_v60 }
 0x181   :  { %v463_v38 = vpack.c.bf16 %v450_v35, %v449_v34  ;;  %v464_v41 = vpack.c.bf16 %v452_v40, %v451_v39  ;;  %v457_v37 = vmul.f32 %v4861_v62, %v4859_v60  ;;  %v458_v28 = vmul.f32 %v4863_v63, %v4859_v60  ;;  %v4264_v40 = vld [vmem:[#allocation7] sm:$0xff]  }
 0x182   :  { %v465_v25 = vpack.c.bf16 %v454_v21, %v453_v20  ;;  %v460_v29 = vmul.f32 %v4873_v9, %v4859_v60  ;;  %v4267_v9 = vld [vmem:[#allocation7 + $0x18] sm:$0xff]   ;;  %v919_v21 = vld [vmem:[#allocation8 + $0x88] sm:$0xff] }
 0x183   :  { %4114 = vmatpush3.bf16.xpose.msra.mxu0 %v438_v59  ;;  %v4198_v59 = vpack.c.bf16 %v565_v58, %v564_v57  ;;  %v3597_v58 = vld [vmem:[%s5069_s4] ss:$0 sm:$0xff] }
 0x184   :  { %4115 = vmatprep.subr.bf16.mxu0 %v4617_v1 }
 0x185   :  { %4126 = vmatpush3.bf16.xpose.msra.mxu1 %v442_v2  ;;  %v567_v2 = vld [vmem:[#allocation13 + $0x18] sm:$0xff] }
 0x186   :  { %4127 = vmatprep.subr.bf16.mxu1 %v4617_v1  ;;  %v4202_v3 = vpack.c.bf16 %v567_v2, %v566_v61 }
 0x18b   :  { %4116 = vmatpush3.bf16.xpose.msra.mxu0 %v439_v7  ;;  %v570_v7 = vld [vmem:[#allocation13 + $0x30] sm:$0xff] }
 0x18c   :  { %4117 = vmatprep.subr.bf16.mxu0 %v4617_v1 }
 0x18d   :  { %4128 = vmatpush3.bf16.xpose.msra.mxu1 %v443_v10  ;;  %v571_v10 = vld [vmem:[#allocation13 + $0x38] sm:$0xff] }
 0x18e   :  { %4129 = vmatprep.subr.bf16.mxu1 %v4617_v1  ;;  %v4210_v12 = vpack.c.bf16 %v571_v10, %v570_v7  ;;  %v902_v7 = vld [vmem:[#allocation8] sm:$0xff] }
 0x18f   :  { %v910_v10 = vld [vmem:[#allocation8 + $0x40] sm:$0xff] }
 0x193   :  { %4118 = vmatpush3.bf16.xpose.msra.mxu0 %v440_v17 }
 0x194   :  { %4199 = vmatprep.subr.bf16.mxu0 %v4198_v59 }
 0x195   :  { %4130 = vmatpush3.bf16.xpose.msra.mxu1 %v444_v19 }
 0x196   :  { %4154 = vmatprep.subr.bf16.mxu1 %v4617_v1 }
 0x19a   :  { %4120 = vmatmul.mubr.bf16.vlgmr.msra.gmra.mrb[4].mxu0 %v411_v26  ;;  %v455_v26 = vmul.f32 %v4845_v47, %v4859_v60  ;;  %v467_v47 = vpack.c.bf16 %v458_v28, %v457_v37 }
 0x19b   :  { %4201 = vmatpush3.bf16.msra.mxu0 %v4198_v59 }
 0x19c   :  { %4132 = vmatmul.mubr.bf16.vlgmr.msra.gmra.mrb[4].mxu1 %v412_v32  ;;  %4203 = vmatprep.subr.bf16.mxu0 %v4202_v3 }
 0x19d   :  { %4155 = vmatpush3.bf16.msra.mxu1 %v461_v27  ;;  %4162 = vmatprep.mubr.msk.bf16.mxu1 %vm4618_vm0, %v4617_v1  ;;  %v456_v27 = vmul.f32 %v4847_v48, %v4859_v60  ;;  %v459_v48 = vmul.f32 %v4871_v8, %v4859_v60  ;;  %v4265_v60 = vld [vmem:[#allocation7 + $0x8] sm:$0xff]   ;;  %v4266_v8 = vld [vmem:[#allocation7 + $0x10] sm:$0xff]  }
 0x19e   :  { %4156 = vmatprep.subr.bf16.mxu1 %v4617_v1 }
 0x19f   :  { %4205 = vmatpush3.bf16.msra.mxu0 %v4202_v3  ;;  %v466_v36 = vpack.c.bf16 %v456_v27, %v455_v26  ;;  %v468_v32 = vpack.c.bf16 %v460_v29, %v459_v48 }
 0x1a0   :  { %4207 = vmatprep.subr.bf16.mxu0 %v4206_v6 }
 0x1a1   :  { %4157 = vmatpush3.bf16.msra.mxu1 %v462_v33 }
 0x1a2   :  { %4158 = vmatprep.subr.bf16.mxu1 %v4617_v1 }
 0x1a3   :  { %4209 = vmatpush3.bf16.msra.mxu0 %v4206_v6 }
 0x1a4   :  { %4211 = vmatprep.subr.bf16.mxu0 %v4210_v12 }
 0x1a5   :  { %4159 = vmatpush3.bf16.msra.mxu1 %v463_v38 }
 0x1a6   :  { %4160 = vmatprep.subr.bf16.mxu1 %v4617_v1 }
 0x1a7   :  { %4213 = vmatpush3.bf16.msra.mxu0 %v4210_v12  ;;  %v903_v12 = vld [vmem:[#allocation8 + $0x8] sm:$0xff] }
 0x1a8   :  { %4166 = vmatprep.subr.bf16.mxu0 %v4617_v1 }
 0x1a9   :  { %4161 = vmatpush3.bf16.msra.mxu1 %v464_v41 }
 0x1aa   :  { %4178 = vmatprep.subr.bf16.mxu1 %v4617_v1 }
 0x26d   :  { %v503_v42 = vpop.f32.mrb[4].mxu0 }
 0x26e   :  { %v549_v43 = vmul.f32 0.25, %v503_v42  ;;  %v4121_v44 = vpop.f32.mrb[5].mxu0  ;;  %v4268_v42 = vld [vmem:[#allocation7 + $0x20] sm:$0xff]  }
 0x26f   :  { %v506_v45 = vpop.f32.mrb[6].mxu0  ;;  %v543_v46 = vpop.f32.mrb[4].mxu1  ;;  %v4270_v44 = vld [vmem:[#allocation7 + $0x30] sm:$0xff]  }
 0x270   :  { %v550_v49 = vmul.f32 0.25, %v543_v46  ;;  %v4122_v51 = vpop.f32.mrb[7].mxu0  ;;  %v4133_v52 = vpop.f32.mrb[5].mxu1  ;;  %v552_v53 = vsel %vm551_vm1, %v549_v43, -inf  ;;  %v4271_v45 = vld [vmem:[#allocation7 + $0x38] sm:$0xff]  }
 0x271   :  { %v546_v54 = vpop.f32.mrb[6].mxu1  ;;  %553 = vmax.xlane.f32.xlu0 %v552_v53 }
 0x272   :  { %v4134_v55 = vpop.f32.mrb[7].mxu1  ;;  %v555_v56 = vsel %vm551_vm1, %v550_v49, -inf }
 0x275   :  { %556 = vmax.xlane.f32.xlu0 %v555_v56 }
 0x2fe   :  { %v554_v13 = vpop.xlane.xlu0 %553 }
 0x2ff   :  { %v558_v14 = vsub.f32 %v549_v43, %v554_v13  ;;  %v4269_v43 = vld [vmem:[#allocation7 + $0x28] sm:$0xff]   ;;  %v3608_v13 = vcombine.low %v902_v7, %v910_v10 }
 0x301   :  { %v560_v15 = vmul.f32 1.442695, %v558_v14  ;;  %v3609_v14 = vcombine.high %v902_v7, %v910_v10  ;;  %v1007_v10 = vld [vmem:[#allocation8 + $0x348] sm:$0xff] }
 0x302   :  { %v557_v16 = vpop.xlane.xlu0 %556 }
 0x303   :  { %4400 = vpow2.f32 %v560_v15  ;;  %v559_v17 = vsub.f32 %v550_v49, %v557_v16  ;;  %v911_v15 = vld [vmem:[#allocation8 + $0x48] sm:$0xff]  ;;  %v918_v16 = vld [vmem:[#allocation8 + $0x80] sm:$0xff] }
 0x305   :  { %v562_v18 = vmul.f32 1.442695, %v559_v17  ;;  %v926_v17 = vld [vmem:[#allocation8 + $0xc0] sm:$0xff] }
 0x306   :  { %v3625_v20 = vcombine.high %v918_v16, %v926_v17 }
 0x307   :  { %4402 = vpow2.f32 %v562_v18  ;;  %v3610_v18 = vcombine.low %v903_v12, %v911_v15 }
 0x30d   :  { %v4401_v19 = vpop.eup %4400 }
 0x30e   :  { %4151 = vmatprep.mubr.msk.f32.mxu0 %vm551_vm1, %v4401_v19 }
 0x311   :  { %v4403_v22 = vpop.eup %4402 }
 0x312   :  { %4152 = vmatmul.mubr.msk.f32.vlgmr.msra.gmra.mrb[8].mxu0 %vm551_vm1, %v4403_v22 }
 0x313   :  { %4167 = vmatpush3.bf16.msra.mxu0 %v465_v25  ;;  %4174 = vmatprep.mubr.msk.bf16.mxu0 %vm4618_vm0, %v4617_v1 }
 0x314   :  { %4168 = vmatprep.subr.bf16.mxu0 %v4617_v1 }
 0x317   :  { %4169 = vmatpush3.bf16.msra.mxu0 %v466_v36 }
 0x318   :  { %4170 = vmatprep.subr.bf16.mxu0 %v4617_v1 }
 0x31b   :  { %4171 = vmatpush3.bf16.msra.mxu0 %v467_v47 }
 0x31c   :  { %4172 = vmatprep.subr.bf16.mxu0 %v4617_v1 }
 0x31f   :  { %4173 = vmatpush3.bf16.msra.mxu0 %v468_v32  ;;  %v934_v32 = vld [vmem:[#allocation8 + $0x100] sm:$0xff] }
 0x320   :  { %1754 = vmatprep.subr.bf16.mxu0 %v3609_v14 }
 0x3e5   :  { %v4153_v33 = vpop.f32.mrb[8].mxu0 }
 0x3e6   :  { %4404 = vrcp.f32 %v4153_v33  ;;  %v644_v62 = vpop.f32.mrb[9].mxu0  ;;  %v942_v33 = vld [vmem:[#allocation8 + $0x140] sm:$0xff] }
 0x3e7   :  { %4406 = vrcp.f32 %v644_v62  ;;  %v935_v62 = vld [vmem:[#allocation8 + $0x108] sm:$0xff] }
 0x3f0   :  { %v4405_v63 = vpop.eup %4404 }
 0x3f1   :  { %v4407_v34 = vpop.eup %4406  ;;  %v656_v35 = vmul.f32 %v4405_v63, %v4403_v22  ;;  %v927_v22 = vld [vmem:[#allocation8 + $0xc8] sm:$0xff]  ;;  %v3641_v63 = vcombine.high %v934_v32, %v942_v33 }
 0x3f2   :  { %v655_v38 = vmul.f32 %v4407_v34, %v4401_v19  ;;  %v3611_v19 = vcombine.high %v903_v12, %v911_v15  ;;  %v3627_v25 = vcombine.high %v919_v21, %v927_v22  ;;  %v943_v34 = vld [vmem:[#allocation8 + $0x148] sm:$0xff]  ;;  %v1014_v15 = vld [vmem:[#allocation8 + $0x380] sm:$0xff] }
 0x3f3   :  { %v658_v39 = vpack.c.bf16 %v656_v35, %v656_v35  ;;  %v3640_v35 = vcombine.low %v934_v32, %v942_v33 }
 0x3f4   :  { %v657_v41 = vpack.c.bf16 %v655_v38, %v655_v38  ;;  %v3642_v38 = vcombine.low %v935_v62, %v943_v34 }
 0x3f5   :  { %4175 = vmatmul.mubr.msk.bf16.vlgmr.msra.gmra.mrb[12].mxu0 %vm551_vm1, %v658_v39  ;;  %v3643_v39 = vcombine.high %v935_v62, %v943_v34 }
 0x3f6   :  { %4163 = vmatmul.mubr.msk.bf16.vlgmr.msra.gmra.mrb[8].mxu1 %vm551_vm1, %v657_v41  ;;  %1786 = vmatprep.mubr.bf16.mxu0 %v4616_v0  ;;  %v958_v41 = vld [vmem:[#allocation8 + $0x1c0] sm:$0xff] }
 0x3f7   :  { %4179 = vmatpush3.bf16.msra.mxu1 %v4264_v40  ;;  %4194 = vmatprep.mubr.msk.bf16.mxu1 %vm4618_vm0, %v4617_v1  ;;  %v950_v40 = vld [vmem:[#allocation8 + $0x180] sm:$0xff] }
 0x3f8   :  { %4180 = vmatprep.subr.bf16.mxu1 %v4617_v1  ;;  %1755 = vmatpush1.bf16.msra.mxu0 %v3608_v13 }
 0x3f9   :  { %1756 = vmatprep.subr.bf16.mxu0 %v3625_v20 }
 0x3fb   :  { %4181 = vmatpush3.bf16.msra.mxu1 %v4265_v60  ;;  %v951_v60 = vld [vmem:[#allocation8 + $0x188] sm:$0xff] }
 0x3fc   :  { %4182 = vmatprep.subr.bf16.mxu1 %v4617_v1 }
 0x3ff   :  { %4183 = vmatpush3.bf16.msra.mxu1 %v4266_v8  ;;  %v3657_v8 = vcombine.high %v950_v40, %v958_v41 }
 0x400   :  { %4184 = vmatprep.subr.bf16.mxu1 %v4617_v1 }
 0x403   :  { %4185 = vmatpush3.bf16.msra.mxu1 %v4267_v9  ;;  %v959_v9 = vld [vmem:[#allocation8 + $0x1c8] sm:$0xff] }
 0x404   :  { %4186 = vmatprep.subr.bf16.mxu1 %v4617_v1 }
 0x407   :  { %4187 = vmatpush3.bf16.msra.mxu1 %v4268_v42  ;;  %v3656_v42 = vcombine.low %v950_v40, %v958_v41 }
 0x408   :  { %4188 = vmatprep.subr.bf16.mxu1 %v4617_v1 }
 0x40b   :  { %4189 = vmatpush3.bf16.msra.mxu1 %v4269_v43  ;;  %v3658_v43 = vcombine.low %v951_v60, %v959_v9 }
 0x40c   :  { %4190 = vmatprep.subr.bf16.mxu1 %v4617_v1 }
 0x40f   :  { %4191 = vmatpush3.bf16.msra.mxu1 %v4270_v44  ;;  %v3659_v44 = vcombine.high %v951_v60, %v959_v9 }
 0x410   :  { %4192 = vmatprep.subr.bf16.mxu1 %v4617_v1 }
 0x413   :  { %4193 = vmatpush3.bf16.msra.mxu1 %v4271_v45  ;;  %v966_v45 = vld [vmem:[#allocation8 + $0x200] sm:$0xff] }
 0x414   :  { %1797 = vmatprep.subr.bf16.mxu1 %v3611_v19  ;;  %v1023_v19 = vld [vmem:[#allocation8 + $0x3c8] sm:$0xff] }
 0x4c8   :  { %v739_v46 = vpop.f32.mrb[12].mxu0 }
 0x4c9   :  { %v696_v49 = vpop.f32.mrb[8].mxu1  ;;  %v4176_v51 = vpop.f32.mrb[13].mxu0 }
 0x4ca   :  { %v745_v52 = vpack.c.bf16 %v739_v46, %v696_v49  ;;  %v4164_v53 = vpop.f32.mrb[9].mxu1  ;;  %v742_v54 = vpop.f32.mrb[14].mxu0  ;;  %v974_v46 = vld [vmem:[#allocation8 + $0x240] sm:$0xff]  ;;  %v967_v49 = vld [vmem:[#allocation8 + $0x208] sm:$0xff] }
 0x4cb   :  { %v699_v55 = vpop.f32.mrb[10].mxu1  ;;  %v4177_v56 = vpop.f32.mrb[15].mxu0  ;;  %v3673_v51 = vcombine.high %v966_v45, %v974_v46  ;;  %v3672_v53 = vcombine.low %v966_v45, %v974_v46  ;;  %v929_v45 = vld [vmem:[#allocation8 + $0xd8] sm:$0xff] }
 0x4cc   :  { %v4165_v57 = vpop.f32.mrb[11].mxu1  ;;  %4195 = vmatmul.mubr.bf16.vlgmr.msra.gmra.mrb[12].mxu1 %v745_v52  ;;  %v975_v52 = vld [vmem:[#allocation8 + $0x248] sm:$0xff]  ;;  %v982_v56 = vld [vmem:[#allocation8 + $0x280] sm:$0xff] }
 0x4cd   :  { %1829 = vmatprep.mubr.bf16.mxu1 %v4616_v0  ;;  %1798 = vmatpush1.bf16.msra.mxu1 %v3610_v18  ;;  %v3674_v54 = vcombine.low %v967_v49, %v975_v52  ;;  %v3675_v55 = vcombine.high %v967_v49, %v975_v52  ;;  %v990_v57 = vld [vmem:[#allocation8 + $0x2c0] sm:$0xff] }
 0x4ce   :  { %1799 = vmatprep.subr.bf16.mxu1 %v3627_v25  ;;  %v904_v25 = vld [vmem:[#allocation8 + $0x10] sm:$0xff] }
 0x59f   :  { %v851_v59 = vpop.f32.mrb[12].mxu1 }
 0x5a0   :  { %v852_v1 = vadd.f32 %v3597_v58, %v851_v59  ;;  %v4196_v61 = vpop.f32.mrb[13].mxu1  ;;  %v3689_v59 = vcombine.high %v982_v56, %v990_v57 }
 0x5a1   :  { %v854_v2 = vpop.f32.mrb[14].mxu1  ;;  %v3688_v61 = vcombine.low %v982_v56, %v990_v57 }
 0x5a2   :  { %v855_v3 = vadd.f32 %v3597_v58, %v854_v2  ;;  %v4197_v4 = vpop.f32.mrb[15].mxu1  ;;  %v858_v5 = vadd.f32 %v852_v1, %v4812_v23  ;;  %v3624_v23 = vcombine.low %v918_v16, %v926_v17  ;;  %v983_v58 = vld [vmem:[#allocation8 + $0x288] sm:$0xff]  ;;  %v1022_v16 = vld [vmem:[#allocation8 + $0x3c0] sm:$0xff] }
 0x5a3   :  { %v991_v1 = vld [vmem:[#allocation8 + $0x2c8] sm:$0xff]  ;;  %v998_v4 = vld [vmem:[#allocation8 + $0x300] sm:$0xff]  ;;  %v3721_v18 = vcombine.high %v1014_v15, %v1022_v16  ;;  %v3720_v20 = vcombine.low %v1014_v15, %v1022_v16 }
 0x5a4   :  { %860 = vadd.xlane.f32.xlu1 %v858_v5  ;;  %v859_v6 = vadd.f32 %v855_v3, %v4814_v24  ;;  %v3626_v24 = vcombine.low %v919_v21, %v927_v22  ;;  %1757 = vmatpush1.bf16.msra.mxu0 %v3624_v23  ;;  %v3690_v2 = vcombine.low %v983_v58, %v991_v1  ;;  %v1015_v17 = vld [vmem:[#allocation8 + $0x388] sm:$0xff]  ;;  %v912_v23 = vld [vmem:[#allocation8 + $0x50] sm:$0xff] }
 0x5a5   :  { %1758 = vmatprep.subr.bf16.mxu0 %v3641_v63  ;;  %v3691_v3 = vcombine.high %v983_v58, %v991_v1  ;;  %v3722_v21 = vcombine.low %v1015_v17, %v1023_v19  ;;  %v3723_v22 = vcombine.high %v1015_v17, %v1023_v19  ;;  %v952_v1 = vld [vmem:[#allocation8 + $0x190] sm:$0xff] }
 0x5a6   :  { %1800 = vmatpush1.bf16.msra.mxu1 %v3626_v24  ;;  %v905_v24 = vld [vmem:[#allocation8 + $0x18] sm:$0xff]  ;;  %v984_v19 = vld [vmem:[#allocation8 + $0x290] sm:$0xff] }
 0x5a7   :  { %1801 = vmatprep.subr.bf16.mxu1 %v3643_v39  ;;  %v3606_v39 = vld [vmem:[%s5070_s5] ss:$0 sm:$0xff] }
 0x5a8   :  { %862 = vadd.xlane.f32.xlu1 %v859_v6  ;;  %1759 = vmatpush1.bf16.msra.mxu0 %v3640_v35 }
 0x5a9   :  { %1760 = vmatprep.subr.bf16.mxu0 %v3657_v8  ;;  %v3607_v8 = vld [vmem:[%s5071_s6] ss:$0 sm:$0xff] }
 0x5aa   :  { %1802 = vmatpush1.bf16.msra.mxu1 %v3642_v38 }
 0x5ab   :  { %1803 = vmatprep.subr.bf16.mxu1 %v3659_v44  ;;  %v921_v44 = vld [vmem:[#allocation8 + $0x98] sm:$0xff] }
 0x5ac   :  { %1761 = vmatpush1.bf16.msra.mxu0 %v3656_v42  ;;  %v920_v42 = vld [vmem:[#allocation8 + $0x90] sm:$0xff]  ;;  %v3631_v52 = vcombine.high %v921_v44, %v929_v45  ;;  %v3630_v57 = vcombine.low %v921_v44, %v929_v45 }
 0x5ad   :  { %1762 = vmatprep.subr.bf16.mxu0 %v3673_v51 }
 0x5ae   :  { %1804 = vmatpush1.bf16.msra.mxu1 %v3658_v43  ;;  %v928_v43 = vld [vmem:[#allocation8 + $0xd0] sm:$0xff] }
 0x5af   :  { %1805 = vmatprep.subr.bf16.mxu1 %v3675_v55  ;;  %v3629_v51 = vcombine.high %v920_v42, %v928_v43  ;;  %v945_v55 = vld [vmem:[#allocation8 + $0x158] sm:$0xff]  ;;  %v3628_v56 = vcombine.low %v920_v42, %v928_v43  ;;  %v907_v42 = vld [vmem:[#allocation8 + $0x28] sm:$0xff] }
 0x5b0   :  { %1763 = vmatpush1.bf16.msra.mxu0 %v3672_v53  ;;  %v944_v53 = vld [vmem:[#allocation8 + $0x150] sm:$0xff]  ;;  %v915_v43 = vld [vmem:[#allocation8 + $0x68] sm:$0xff] }
 0x5b1   :  { %1764 = vmatprep.subr.bf16.mxu0 %v3689_v59 }
 0x5b2   :  { %1806 = vmatpush1.bf16.msra.mxu1 %v3674_v54  ;;  %v937_v54 = vld [vmem:[#allocation8 + $0x118] sm:$0xff] }
 0x5b3   :  { %1807 = vmatprep.subr.bf16.mxu1 %v3691_v3  ;;  %v3647_v59 = vcombine.high %v937_v54, %v945_v55  ;;  %v961_v3 = vld [vmem:[#allocation8 + $0x1d8] sm:$0xff] }
 0x5b4   :  { %1765 = vmatpush1.bf16.msra.mxu0 %v3688_v61  ;;  %v960_v61 = vld [vmem:[#allocation8 + $0x1d0] sm:$0xff] }
 0x5b5   :  { %v3660_v15 = vcombine.low %v952_v1, %v960_v61 }
 0x5b6   :  { %1808 = vmatpush1.bf16.msra.mxu1 %v3690_v2  ;;  %v953_v2 = vld [vmem:[#allocation8 + $0x198] sm:$0xff] }
 0x5b7   :  { %v3662_v16 = vcombine.low %v953_v2, %v961_v3 }
 0x631   :  { %v861_v26 = vpop.xlane.xlu1 %860 }
 0x632   :  { %v865_v27 = vmul.f32 0.0078125, %v861_v26  ;;  %v3612_v26 = vcombine.low %v904_v25, %v912_v23 }
 0x634   :  { %v4944_v36 = vsub.f32 %v858_v5, %v865_v27  ;;  %v1006_v5 = vld [vmem:[#allocation8 + $0x340] sm:$0xff]  ;;  %v3613_v27 = vcombine.high %v904_v25, %v912_v23 }
 0x635   :  { %v863_v37 = vpop.xlane.xlu1 %862  ;;  %v3705_v7 = vcombine.high %v998_v4, %v1006_v5  ;;  %v3704_v12 = vcombine.low %v998_v4, %v1006_v5  ;;  %v3646_v5 = vcombine.low %v937_v54, %v945_v55  ;;  %v923_v54 = vld [vmem:[#allocation8 + $0xa8] sm:$0xff] }
 0x636   :  { %v866_v28 = vmul.f32 0.0078125, %v863_v37  ;;  %v869_v47 = vmul.f32 %v4944_v36, %v4944_v36  ;;  %v913_v37 = vld [vmem:[#allocation8 + $0x58] sm:$0xff]  ;;  %v931_v55 = vld [vmem:[#allocation8 + $0xe8] sm:$0xff] }
 0x637   :  { %1766 = vmatprep.subr.bf16.mxu0 %v3705_v7  ;;  %v3663_v7 = vcombine.high %v953_v2, %v961_v3  ;;  %v939_v2 = vld [vmem:[#allocation8 + $0x128] sm:$0xff] }
 0x638   :  { %v4948_v48 = vsub.f32 %v859_v6, %v866_v28  ;;  %871 = vadd.xlane.f32.xlu0 %v869_v47  ;;  %v999_v6 = vld [vmem:[#allocation8 + $0x308] sm:$0xff]  ;;  %1767 = vmatpush1.bf16.msra.mxu0 %v3704_v12  ;;  %v3614_v28 = vcombine.low %v905_v24, %v913_v37  ;;  %v3615_v47 = vcombine.high %v905_v24, %v913_v37  ;;  %v976_v12 = vld [vmem:[#allocation8 + $0x250] sm:$0xff] }
 0x639   :  { %v3706_v13 = vcombine.low %v999_v6, %v1007_v10  ;;  %v3707_v14 = vcombine.high %v999_v6, %v1007_v10  ;;  %1768 = vmatprep.subr.bf16.mxu0 %v3721_v18  ;;  %v3661_v6 = vcombine.high %v952_v1, %v960_v61  ;;  %v968_v10 = vld [vmem:[#allocation8 + $0x210] sm:$0xff]  ;;  %v938_v1 = vld [vmem:[#allocation8 + $0x120] sm:$0xff]  ;;  %v947_v3 = vld [vmem:[#allocation8 + $0x168] sm:$0xff] }
 0x63a   :  { %v870_v29 = vmul.f32 %v4948_v48, %v4948_v48  ;;  %v3677_v17 = vcombine.high %v968_v10, %v976_v12  ;;  %v3676_v25 = vcombine.low %v968_v10, %v976_v12  ;;  %v1008_v37 = vld [vmem:[#allocation8 + $0x350] sm:$0xff]  ;;  %v946_v61 = vld [vmem:[#allocation8 + $0x160] sm:$0xff] }
 0x63b   :  { %1809 = vmatprep.subr.bf16.mxu1 %v3707_v14  ;;  %v977_v14 = vld [vmem:[#allocation8 + $0x258] sm:$0xff]  ;;  %v954_v10 = vld [vmem:[#allocation8 + $0x1a0] sm:$0xff] }
 0x63c   :  { %873 = vadd.xlane.f32.xlu1 %v870_v29  ;;  %1810 = vmatpush1.bf16.msra.mxu1 %v3706_v13  ;;  %v969_v13 = vld [vmem:[#allocation8 + $0x218] sm:$0xff]  ;;  %v962_v12 = vld [vmem:[#allocation8 + $0x1e0] sm:$0xff] }
 0x63d   :  { %1811 = vmatprep.subr.bf16.mxu1 %v3723_v22  ;;  %1769 = vmatpush1.bf16.msra.mxu0 %v3720_v20  ;;  %v3679_v18 = vcombine.high %v969_v13, %v977_v14  ;;  %v992_v20 = vld [vmem:[#allocation8 + $0x2d0] sm:$0xff]  ;;  %v993_v22 = vld [vmem:[#allocation8 + $0x2d8] sm:$0xff]  ;;  %v3678_v23 = vcombine.low %v969_v13, %v977_v14  ;;  %v955_v13 = vld [vmem:[#allocation8 + $0x1a8] sm:$0xff] }
 0x63e   :  { %1840 = vmatprep.subr.bf16.mxu0 %v3613_v27  ;;  %v3693_v24 = vcombine.high %v984_v19, %v992_v20  ;;  %v1000_v27 = vld [vmem:[#allocation8 + $0x310] sm:$0xff]  ;;  %v963_v14 = vld [vmem:[#allocation8 + $0x1e8] sm:$0xff] }
 0x640   :  { %1812 = vmatpush1.bf16.msra.mxu1 %v3722_v21  ;;  %v985_v21 = vld [vmem:[#allocation8 + $0x298] sm:$0xff] }
 0x641   :  { %1883 = vmatprep.subr.bf16.mxu1 %v3615_v47  ;;  %v1009_v47 = vld [vmem:[#allocation8 + $0x358] sm:$0xff] }
 0x6c5   :  { %v872_v29 = vpop.xlane.xlu0 %871 }
 0x6c6   :  { %v875_v32 = vmul.f32 0.0078125, %v872_v29  ;;  %v3692_v29 = vcombine.low %v984_v19, %v992_v20  ;;  %v970_v19 = vld [vmem:[#allocation8 + $0x220] sm:$0xff] }
 0x6c7   :  { %v978_v20 = vld [vmem:[#allocation8 + $0x260] sm:$0xff] }
 0x6c8   :  { %v877_v33 = vadd.f32 1e-05, %v875_v32  ;;  %v3694_v32 = vcombine.low %v985_v21, %v993_v22 }
 0x6c9   :  { %v874_v62 = vpop.xlane.xlu1 %873 }
 0x6ca   :  { %4408 = vrsqrt.f32 %v877_v33  ;;  %v876_v63 = vmul.f32 0.0078125, %v874_v62  ;;  %v3709_v33 = vcombine.high %v1000_v27, %v1008_v37 }
 0x6cc   :  { %v878_v34 = vadd.f32 1e-05, %v876_v63  ;;  %v1016_v63 = vld [vmem:[#allocation8 + $0x390] sm:$0xff] }
 0x6ce   :  { %4410 = vrsqrt.f32 %v878_v34  ;;  %v1024_v34 = vld [vmem:[#allocation8 + $0x3d0] sm:$0xff] }
 0x6cf   :  { %v3724_v44 = vcombine.low %v1016_v63, %v1024_v34 }
 0x6d4   :  { %v4409_v35 = vpop.eup %4408 }
 0x6d5   :  { %v881_v38 = vmul.f32 %v4409_v35, %v4944_v36  ;;  %v1017_v35 = vld [vmem:[#allocation8 + $0x398] sm:$0xff] }
 0x6d7   :  { %v890_v41 = vmul.f32 %v3606_v39, %v881_v38  ;;  %v1025_v38 = vld [vmem:[#allocation8 + $0x3d8] sm:$0xff] }
 0x6d8   :  { %v4411_v40 = vpop.eup %4410  ;;  %v3726_v45 = vcombine.low %v1017_v35, %v1025_v38 }
 0x6d9   :  { %v882_v60 = vmul.f32 %v4411_v40, %v4948_v48  ;;  %v4960_v46 = vadd.f32 %v3607_v8, %v890_v41  ;;  %v936_v48 = vld [vmem:[#allocation8 + $0x110] sm:$0xff]  ;;  %v3725_v41 = vcombine.high %v1016_v63, %v1024_v34  ;;  %v1002_v63 = vld [vmem:[#allocation8 + $0x320] sm:$0xff] }
 0x6da   :  { %v3645_v58 = vcombine.high %v936_v48, %v944_v53  ;;  %v3644_v4 = vcombine.low %v936_v48, %v944_v53  ;;  %v922_v48 = vld [vmem:[#allocation8 + $0xa0] sm:$0xff] }
 0x6db   :  { %v891_v9 = vmul.f32 %v3606_v39, %v882_v60  ;;  %v3708_v39 = vcombine.low %v1000_v27, %v1008_v37  ;;  %v3727_v60 = vcombine.high %v1017_v35, %v1025_v38  ;;  %v930_v53 = vld [vmem:[#allocation8 + $0xe0] sm:$0xff]  ;;  %v1003_v35 = vld [vmem:[#allocation8 + $0x328] sm:$0xff] }
 0x6dc   :  { %v986_v27 = vld [vmem:[#allocation8 + $0x2a0] sm:$0xff]  ;;  %v1011_v38 = vld [vmem:[#allocation8 + $0x368] sm:$0xff] }
 0x6dd   :  { %v4962_v36 = vadd.f32 %v3607_v8, %v891_v9  ;;  %v906_v8 = vld [vmem:[#allocation8 + $0x20] sm:$0xff] }
 0x6de   :  { %v914_v9 = vld [vmem:[#allocation8 + $0x60] sm:$0xff] }
 0x6df   :  { %v4966_v49 = vpack.c.bf16 %v4962_v36, %v4960_v46  ;;  %v994_v37 = vld [vmem:[#allocation8 + $0x2e0] sm:$0xff] }
 0x6e0   :  { %v1010_v34 = vld [vmem:[#allocation8 + $0x360] sm:$0xff] }
 0x6e1   :  { %1787 = vmatmul.mubr.bf16.vlgmr.msra.gmra.mrb[16].mxu0 %v4966_v49  ;;  %1830 = vmatmul.mubr.bf16.vlgmr.msra.gmra.mrb[16].mxu1 %v4966_v49 }
 0x6e2   :  { %1841 = vmatpush1.bf16.msra.mxu0 %v3612_v26  ;;  %1884 = vmatpush1.bf16.msra.mxu1 %v3614_v28  ;;  %v3695_v26 = vcombine.high %v985_v21, %v993_v22  ;;  %v1001_v28 = vld [vmem:[#allocation8 + $0x318] sm:$0xff]  ;;  %v971_v21 = vld [vmem:[#allocation8 + $0x228] sm:$0xff] }
 0x6e3   :  { %1842 = vmatprep.subr.bf16.mxu0 %v3629_v51  ;;  %1885 = vmatprep.subr.bf16.mxu1 %v3631_v52  ;;  %v3711_v62 = vcombine.high %v1001_v28, %v1009_v47  ;;  %v3710_v40 = vcombine.low %v1001_v28, %v1009_v47  ;;  %v3617_v51 = vcombine.high %v906_v8, %v914_v9  ;;  %v979_v22 = vld [vmem:[#allocation8 + $0x268] sm:$0xff] }
 0x6e4   :  { %1872 = vmatprep.mubr.bf16.mxu0 %v4616_v0  ;;  %1915 = vmatprep.mubr.bf16.mxu1 %v4616_v0  ;;  %v3619_v52 = vcombine.high %v907_v42, %v915_v43  ;;  %v987_v28 = vld [vmem:[#allocation8 + $0x2a8] sm:$0xff] }
 0x6e5   :  { %v995_v47 = vld [vmem:[#allocation8 + $0x2e8] sm:$0xff] }
 0x6e6   :  { %1843 = vmatpush1.bf16.msra.mxu0 %v3628_v56  ;;  %1886 = vmatpush1.bf16.msra.mxu1 %v3630_v57  ;;  %v3616_v56 = vcombine.low %v906_v8, %v914_v9  ;;  %v3618_v57 = vcombine.low %v907_v42, %v915_v43  ;;  %v1018_v8 = vld [vmem:[#allocation8 + $0x3a0] sm:$0xff]  ;;  %v1019_v42 = vld [vmem:[#allocation8 + $0x3a8] sm:$0xff] }
 0x6e7   :  { %1844 = vmatprep.subr.bf16.mxu0 %v3645_v58  ;;  %1887 = vmatprep.subr.bf16.mxu1 %v3647_v59  ;;  %v3633_v58 = vcombine.high %v922_v48, %v930_v53  ;;  %v3635_v59 = vcombine.high %v923_v54, %v931_v55  ;;  %v1026_v9 = vld [vmem:[#allocation8 + $0x3e0] sm:$0xff]  ;;  %v1027_v43 = vld [vmem:[#allocation8 + $0x3e8] sm:$0xff] }
 0x6ea   :  { %1845 = vmatpush1.bf16.msra.mxu0 %v3644_v4  ;;  %1888 = vmatpush1.bf16.msra.mxu1 %v3646_v5  ;;  %v3632_v4 = vcombine.low %v922_v48, %v930_v53  ;;  %v3634_v5 = vcombine.low %v923_v54, %v931_v55  ;;  %v908_v48 = vld [vmem:[#allocation8 + $0x30] sm:$0xff]  ;;  %v909_v54 = vld [vmem:[#allocation8 + $0x38] sm:$0xff] }
 0x6eb   :  { %1846 = vmatprep.subr.bf16.mxu0 %v3661_v6  ;;  %1889 = vmatprep.subr.bf16.mxu1 %v3663_v7  ;;  %v3649_v6 = vcombine.high %v938_v1, %v946_v61  ;;  %v3651_v7 = vcombine.high %v939_v2, %v947_v3  ;;  %v916_v53 = vld [vmem:[#allocation8 + $0x70] sm:$0xff]  ;;  %v917_v55 = vld [vmem:[#allocation8 + $0x78] sm:$0xff] }
 0x6ee   :  { %1847 = vmatpush1.bf16.msra.mxu0 %v3660_v15  ;;  %1890 = vmatpush1.bf16.msra.mxu1 %v3662_v16  ;;  %v3648_v15 = vcombine.low %v938_v1, %v946_v61  ;;  %v3650_v16 = vcombine.low %v939_v2, %v947_v3  ;;  %v924_v1 = vld [vmem:[#allocation8 + $0xb0] sm:$0xff]  ;;  %v925_v2 = vld [vmem:[#allocation8 + $0xb8] sm:$0xff] }
 0x6ef   :  { %1848 = vmatprep.subr.bf16.mxu0 %v3677_v17  ;;  %1891 = vmatprep.subr.bf16.mxu1 %v3679_v18  ;;  %v3665_v17 = vcombine.high %v954_v10, %v962_v12  ;;  %v3667_v18 = vcombine.high %v955_v13, %v963_v14  ;;  %v932_v61 = vld [vmem:[#allocation8 + $0xf0] sm:$0xff]  ;;  %v933_v3 = vld [vmem:[#allocation8 + $0xf8] sm:$0xff] }
 0x6f2   :  { %1849 = vmatpush1.bf16.msra.mxu0 %v3676_v25  ;;  %1892 = vmatpush1.bf16.msra.mxu1 %v3678_v23  ;;  %v3664_v25 = vcombine.low %v954_v10, %v962_v12  ;;  %v3666_v23 = vcombine.low %v955_v13, %v963_v14  ;;  %v940_v10 = vld [vmem:[#allocation8 + $0x130] sm:$0xff]  ;;  %v941_v13 = vld [vmem:[#allocation8 + $0x138] sm:$0xff] }
 0x6f3   :  { %1850 = vmatprep.subr.bf16.mxu0 %v3693_v24  ;;  %1893 = vmatprep.subr.bf16.mxu1 %v3695_v26  ;;  %v3681_v24 = vcombine.high %v970_v19, %v978_v20  ;;  %v3683_v26 = vcombine.high %v971_v21, %v979_v22  ;;  %v948_v12 = vld [vmem:[#allocation8 + $0x170] sm:$0xff]  ;;  %v949_v14 = vld [vmem:[#allocation8 + $0x178] sm:$0xff] }
 0x6f6   :  { %1851 = vmatpush1.bf16.msra.mxu0 %v3692_v29  ;;  %1894 = vmatpush1.bf16.msra.mxu1 %v3694_v32  ;;  %v3680_v29 = vcombine.low %v970_v19, %v978_v20  ;;  %v3682_v32 = vcombine.low %v971_v21, %v979_v22  ;;  %v956_v19 = vld [vmem:[#allocation8 + $0x1b0] sm:$0xff]  ;;  %v957_v21 = vld [vmem:[#allocation8 + $0x1b8] sm:$0xff] }
 0x6f7   :  { %1852 = vmatprep.subr.bf16.mxu0 %v3709_v33  ;;  %1895 = vmatprep.subr.bf16.mxu1 %v3711_v62  ;;  %v3697_v33 = vcombine.high %v986_v27, %v994_v37  ;;  %v3699_v62 = vcombine.high %v987_v28, %v995_v47  ;;  %v964_v20 = vld [vmem:[#allocation8 + $0x1f0] sm:$0xff]  ;;  %v965_v22 = vld [vmem:[#allocation8 + $0x1f8] sm:$0xff] }
 0x6fa   :  { %1853 = vmatpush1.bf16.msra.mxu0 %v3708_v39  ;;  %1896 = vmatpush1.bf16.msra.mxu1 %v3710_v40  ;;  %v3696_v39 = vcombine.low %v986_v27, %v994_v37  ;;  %v3698_v40 = vcombine.low %v987_v28, %v995_v47  ;;  %v972_v27 = vld [vmem:[#allocation8 + $0x230] sm:$0xff]  ;;  %v973_v28 = vld [vmem:[#allocation8 + $0x238] sm:$0xff] }
 0x6fb   :  { %1854 = vmatprep.subr.bf16.mxu0 %v3725_v41  ;;  %1897 = vmatprep.subr.bf16.mxu1 %v3727_v60  ;;  %v3713_v41 = vcombine.high %v1002_v63, %v1010_v34  ;;  %v3715_v60 = vcombine.high %v1003_v35, %v1011_v38  ;;  %v980_v37 = vld [vmem:[#allocation8 + $0x270] sm:$0xff]  ;;  %v981_v47 = vld [vmem:[#allocation8 + $0x278] sm:$0xff] }
 0x6fe   :  { %1855 = vmatpush1.bf16.msra.mxu0 %v3724_v44  ;;  %1898 = vmatpush1.bf16.msra.mxu1 %v3726_v45  ;;  %v3712_v44 = vcombine.low %v1002_v63, %v1010_v34  ;;  %v3714_v45 = vcombine.low %v1003_v35, %v1011_v38  ;;  %v996_v63 = vld [vmem:[#allocation8 + $0x2f0] sm:$0xff]  ;;  %v989_v34 = vld [vmem:[#allocation8 + $0x2b8] sm:$0xff]  ;;  %v3684_v38 = vcombine.low %v972_v27, %v980_v37 }
 0x6ff   :  { %1926 = vmatprep.subr.bf16.mxu0 %v3617_v51  ;;  %1969 = vmatprep.subr.bf16.mxu1 %v3619_v52  ;;  %v3729_v51 = vcombine.high %v1018_v8, %v1026_v9  ;;  %v3731_v52 = vcombine.high %v1019_v42, %v1027_v43  ;;  %v997_v35 = vld [vmem:[#allocation8 + $0x2f8] sm:$0xff] }
 0x701   :  { %1873 = vmatmul.mubr.bf16.vlgmr.msra.gmra.mrb[20].mxu0 %v4966_v49  ;;  %1916 = vmatmul.mubr.bf16.vlgmr.msra.gmra.mrb[20].mxu1 %v4966_v49 }
 0x702   :  { %1927 = vmatpush1.bf16.msra.mxu0 %v3616_v56  ;;  %1970 = vmatpush1.bf16.msra.mxu1 %v3618_v57  ;;  %v3728_v56 = vcombine.low %v1018_v8, %v1026_v9  ;;  %v3730_v57 = vcombine.low %v1019_v42, %v1027_v43  ;;  %v1012_v8 = vld [vmem:[#allocation8 + $0x370] sm:$0xff]  ;;  %v1005_v9 = vld [vmem:[#allocation8 + $0x338] sm:$0xff] }
 0x703   :  { %1928 = vmatprep.subr.bf16.mxu0 %v3633_v58  ;;  %1971 = vmatprep.subr.bf16.mxu1 %v3635_v59  ;;  %v3621_v58 = vcombine.high %v908_v48, %v916_v53  ;;  %v3623_v59 = vcombine.high %v909_v54, %v917_v55  ;;  %v1013_v42 = vld [vmem:[#allocation8 + $0x378] sm:$0xff] }
 0x704   :  { %1958 = vmatprep.mubr.bf16.mxu0 %v4616_v0  ;;  %2001 = vmatprep.mubr.bf16.mxu1 %v4616_v0 }
 0x706   :  { %1929 = vmatpush1.bf16.msra.mxu0 %v3632_v4  ;;  %1972 = vmatpush1.bf16.msra.mxu1 %v3634_v5  ;;  %v3620_v4 = vcombine.low %v908_v48, %v916_v53  ;;  %v3622_v5 = vcombine.low %v909_v54, %v917_v55  ;;  %v1028_v48 = vld [vmem:[#allocation8 + $0x3f0] sm:$0xff]  ;;  %v1021_v53 = vld [vmem:[#allocation8 + $0x3b8] sm:$0xff] }
 0x707   :  { %1930 = vmatprep.subr.bf16.mxu0 %v3649_v6  ;;  %1973 = vmatprep.subr.bf16.mxu1 %v3651_v7  ;;  %v3637_v6 = vcombine.high %v924_v1, %v932_v61  ;;  %v3639_v7 = vcombine.high %v925_v2, %v933_v3  ;;  %v1029_v54 = vld [vmem:[#allocation8 + $0x3f8] sm:$0xff] }
 0x70a   :  { %1931 = vmatpush1.bf16.msra.mxu0 %v3648_v15  ;;  %1974 = vmatpush1.bf16.msra.mxu1 %v3650_v16  ;;  %v3636_v15 = vcombine.low %v924_v1, %v932_v61  ;;  %v3638_v16 = vcombine.low %v925_v2, %v933_v3  ;;  %v3734_v1 = vcombine.low %v1021_v53, %v1029_v54  ;;  %v4272_v61 = vld [vmem:[#allocation10 + $0x40] sm:$0xff]  }
 0x70b   :  { %1932 = vmatprep.subr.bf16.mxu0 %v3665_v17  ;;  %1975 = vmatprep.subr.bf16.mxu1 %v3667_v18  ;;  %v3653_v17 = vcombine.high %v940_v10, %v948_v12  ;;  %v3655_v18 = vcombine.high %v941_v13, %v949_v14  ;;  %v4273_v2 = vld [vmem:[#allocation10 + $0xc0] sm:$0xff]  }
 0x70c   :  { %v4274_v3 = vld [vmem:[#allocation10] sm:$0xff]  }
 0x70e   :  { %1933 = vmatpush1.bf16.msra.mxu0 %v3664_v25  ;;  %1976 = vmatpush1.bf16.msra.mxu1 %v3666_v23  ;;  %v3652_v25 = vcombine.low %v940_v10, %v948_v12  ;;  %v3654_v23 = vcombine.low %v941_v13, %v949_v14  ;;  %v4279_v10 = vld [vmem:[#allocation10 + $0x88] sm:$0xff]   ;;  %v4280_v12 = vld [vmem:[#allocation10 + $0x50] sm:$0xff]  }
 0x70f   :  { %1934 = vmatprep.subr.bf16.mxu0 %v3681_v24  ;;  %1977 = vmatprep.subr.bf16.mxu1 %v3683_v26  ;;  %v3669_v24 = vcombine.high %v956_v19, %v964_v20  ;;  %v3671_v26 = vcombine.high %v957_v21, %v965_v22  ;;  %v4281_v13 = vld [vmem:[#allocation10 + $0xd0] sm:$0xff]  }
 0x710   :  { %v4282_v14 = vld [vmem:[#allocation10 + $0x10] sm:$0xff]  }
 0x712   :  { %1935 = vmatpush1.bf16.msra.mxu0 %v3680_v29  ;;  %1978 = vmatpush1.bf16.msra.mxu1 %v3682_v32  ;;  %v3668_v29 = vcombine.low %v956_v19, %v964_v20  ;;  %v3670_v32 = vcombine.low %v957_v21, %v965_v22  ;;  %v4288_v19 = vld [vmem:[#allocation10 + $0x60] sm:$0xff]  }
 0x713   :  { %1936 = vmatprep.subr.bf16.mxu0 %v3697_v33  ;;  %1979 = vmatprep.subr.bf16.mxu1 %v3699_v62  ;;  %v3685_v33 = vcombine.high %v972_v27, %v980_v37  ;;  %v988_v62 = vld [vmem:[#allocation8 + $0x2b0] sm:$0xff]  ;;  %v4289_v20 = vld [vmem:[#allocation10 + $0xe0] sm:$0xff]  }
 0x714   :  { %v3700_v43 = vcombine.low %v988_v62, %v996_v63  ;;  %v4290_v21 = vld [vmem:[#allocation10 + $0x20] sm:$0xff]   ;;  %v4296_v27 = vld [vmem:[#allocation10 + $0x70] sm:$0xff]  }
 0x715   :  { %v4291_v22 = vld [vmem:[#allocation10 + $0xa0] sm:$0xff]   ;;  %v4297_v37 = vld [vmem:[#allocation10 + $0xf0] sm:$0xff]  }
 0x716   :  { %1937 = vmatpush1.bf16.msra.mxu0 %v3696_v39  ;;  %1980 = vmatpush1.bf16.msra.mxu1 %v3698_v40  ;;  %v3686_v39 = vcombine.low %v973_v28, %v981_v47  ;;  %v3701_v40 = vcombine.high %v988_v62, %v996_v63  ;;  %v4304_v62 = vld [vmem:[#allocation10 + $0x140] sm:$0xff]  }
 0x717   :  { %1938 = vmatprep.subr.bf16.mxu0 %v3713_v41  ;;  %1981 = vmatprep.subr.bf16.mxu1 %v3715_v60  ;;  %v3703_v41 = vcombine.high %v989_v34, %v997_v35  ;;  %v1004_v60 = vld [vmem:[#allocation8 + $0x330] sm:$0xff]  ;;  %v4305_v63 = vld [vmem:[#allocation10 + $0x1c0] sm:$0xff]  }
 0x718   :  { %v3716_v55 = vcombine.low %v1004_v60, %v1012_v8 }
 0x71a   :  { %1939 = vmatpush1.bf16.msra.mxu0 %v3712_v44  ;;  %1982 = vmatpush1.bf16.msra.mxu1 %v3714_v45  ;;  %v3702_v44 = vcombine.low %v989_v34, %v997_v35  ;;  %v3717_v45 = vcombine.high %v1004_v60, %v1012_v8  ;;  %v4985_v34 = vld [vmem:[%s5073_s8] sm:$0xff]  ;;  %v1048_v35 = vsub.s32 3, %v4828_v30 }
 0x71b   :  { %1940 = vmatprep.subr.bf16.mxu0 %v3729_v51  ;;  %1983 = vmatprep.subr.bf16.mxu1 %v3731_v52  ;;  %v3719_v51 = vcombine.high %v1005_v9, %v1013_v42  ;;  %v1020_v52 = vld [vmem:[#allocation8 + $0x3b0] sm:$0xff] }
 0x71e   :  { %1941 = vmatpush1.bf16.msra.mxu0 %v3728_v56  ;;  %1984 = vmatpush1.bf16.msra.mxu1 %v3730_v57  ;;  %v3718_v56 = vcombine.low %v1005_v9, %v1013_v42  ;;  %v3733_v57 = vcombine.high %v1020_v52, %v1028_v48 }
 0x71f   :  { %2012 = vmatprep.subr.bf16.mxu0 %v3621_v58  ;;  %2055 = vmatprep.subr.bf16.mxu1 %v3623_v59  ;;  %v3735_v58 = vcombine.high %v1021_v53, %v1029_v54  ;;  %v3732_v59 = vcombine.low %v1020_v52, %v1028_v48 }
 0x721   :  { %1959 = vmatmul.mubr.bf16.vlgmr.msra.gmra.mrb[24].mxu0 %v4966_v49  ;;  %2002 = vmatmul.mubr.bf16.vlgmr.msra.gmra.mrb[24].mxu1 %v4966_v49 }
 0x722   :  { %2013 = vmatpush1.bf16.msra.mxu0 %v3620_v4  ;;  %2056 = vmatpush1.bf16.msra.mxu1 %v3622_v5  ;;  %v4275_v4 = vld [vmem:[#allocation10 + $0x80] sm:$0xff]   ;;  %v4276_v5 = vld [vmem:[#allocation10 + $0x48] sm:$0xff]  }
 0x723   :  { %2014 = vmatprep.subr.bf16.mxu0 %v3637_v6  ;;  %2057 = vmatprep.subr.bf16.mxu1 %v3639_v7  ;;  %v4277_v6 = vld [vmem:[#allocation10 + $0xc8] sm:$0xff]  }
 0x724   :  { %2044 = vmatprep.mubr.bf16.mxu0 %v4616_v0  ;;  %2087 = vmatprep.mubr.bf16.mxu1 %v4616_v0  ;;  %v3687_v0 = vcombine.high %v973_v28, %v981_v47  ;;  %v4278_v7 = vld [vmem:[#allocation10 + $0x8] sm:$0xff]   ;;  %v4298_v28 = vld [vmem:[#allocation10 + $0x30] sm:$0xff]  }
 0x725   :  { %v4299_v47 = vld [vmem:[#allocation10 + $0xb0] sm:$0xff]  }
 0x726   :  { %2015 = vmatpush1.bf16.msra.mxu0 %v3636_v15  ;;  %2058 = vmatpush1.bf16.msra.mxu1 %v3638_v16  ;;  %v4283_v15 = vld [vmem:[#allocation10 + $0x90] sm:$0xff]   ;;  %v4284_v16 = vld [vmem:[#allocation10 + $0x58] sm:$0xff]  }
 0x727   :  { %2016 = vmatprep.subr.bf16.mxu0 %v3653_v17  ;;  %2059 = vmatprep.subr.bf16.mxu1 %v3655_v18  ;;  %v4285_v17 = vld [vmem:[#allocation10 + $0xd8] sm:$0xff]  }
 0x728   :  { %v4286_v18 = vld [vmem:[#allocation10 + $0x18] sm:$0xff]  }
 0x72a   :  { %2017 = vmatpush1.bf16.msra.mxu0 %v3652_v25  ;;  %2060 = vmatpush1.bf16.msra.mxu1 %v3654_v23  ;;  %v4292_v25 = vld [vmem:[#allocation10 + $0x68] sm:$0xff]  }
 0x72b   :  { %2018 = vmatprep.subr.bf16.mxu0 %v3669_v24  ;;  %2061 = vmatprep.subr.bf16.mxu1 %v3671_v26  ;;  %v4293_v23 = vld [vmem:[#allocation10 + $0xe8] sm:$0xff]  }
 0x72c   :  { %v4294_v24 = vld [vmem:[#allocation10 + $0x28] sm:$0xff]  }
 0x72d   :  { %v4295_v26 = vld [vmem:[#allocation10 + $0xa8] sm:$0xff]  }
 0x72e   :  { %2019 = vmatpush1.bf16.msra.mxu0 %v3668_v29  ;;  %2062 = vmatpush1.bf16.msra.mxu1 %v3670_v32  ;;  %v4300_v29 = vld [vmem:[#allocation10 + $0x78] sm:$0xff]  }
 0x72f   :  { %2020 = vmatprep.subr.bf16.mxu0 %v3685_v33  ;;  %2063 = vmatprep.subr.bf16.mxu1 %v3687_v0  ;;  %v4301_v32 = vld [vmem:[#allocation10 + $0xf8] sm:$0xff]  }
 0x730   :  { %v4302_v33 = vld [vmem:[#allocation10 + $0x38] sm:$0xff]  }
 0x731   :  { %v4303_v0 = vld [vmem:[#allocation10 + $0xb8] sm:$0xff]  }
 0x732   :  { %2021 = vmatpush1.bf16.msra.mxu0 %v3684_v38  ;;  %2064 = vmatpush1.bf16.msra.mxu1 %v3686_v39  ;;  %v1037_v38 = vrot.slane %v4985_v34, %v4876_v11  ;;  %v1045_v39 = vrot.slane %v4985_v34, %v4850_v50 }
 0x733   :  { %2022 = vmatprep.subr.bf16.mxu0 %v3701_v40  ;;  %2065 = vmatprep.subr.bf16.mxu1 %v3703_v41  ;;  %v1041_v40 = vrot.slane %v4985_v34, %v4831_v31  ;;  %v1049_v41 = vrot.slane %v4985_v34, %v1048_v35 }
 0x736   :  { %2023 = vmatpush1.bf16.msra.mxu0 %v3700_v43  ;;  %2066 = vmatpush1.bf16.msra.mxu1 %v3702_v44 }
 0x737   :  { %2024 = vmatprep.subr.bf16.mxu0 %v3717_v45  ;;  %2067 = vmatprep.subr.bf16.mxu1 %v3719_v51 }
 0x73a   :  { %2025 = vmatpush1.bf16.msra.mxu0 %v3716_v55  ;;  %2068 = vmatpush1.bf16.msra.mxu1 %v3718_v56 }
 0x73b   :  { %2026 = vmatprep.subr.bf16.mxu0 %v3733_v57  ;;  %2069 = vmatprep.subr.bf16.mxu1 %v3735_v58 }
 0x73e   :  { %2027 = vmatpush1.bf16.msra.mxu0 %v3732_v59  ;;  %2070 = vmatpush1.bf16.msra.mxu1 %v3734_v1 }
 0x73f   :  { %3915 = vmatprep.subr.bf16.mxu0 %v4272_v61  ;;  %3937 = vmatprep.subr.bf16.mxu1 %v4273_v2 }
 0x741   :  { %2045 = vmatmul.mubr.bf16.vlgmr.msra.gmra.mrb[28].mxu0 %v4966_v49  ;;  %2088 = vmatmul.mubr.bf16.vlgmr.msra.gmra.mrb[28].mxu1 %v4966_v49  ;;  %v4287_v49 = vld [vmem:[#allocation10 + $0x98] sm:$0xff]  }
 0x742   :  { %3916 = vmatpush3.bf16.msra.mxu0 %v4274_v3  ;;  %3938 = vmatpush3.bf16.msra.mxu1 %v4275_v4 }
 0x743   :  { %3917 = vmatprep.subr.bf16.mxu0 %v4276_v5  ;;  %3939 = vmatprep.subr.bf16.mxu1 %v4277_v6 }
 0x746   :  { %3918 = vmatpush3.bf16.msra.mxu0 %v4278_v7  ;;  %3940 = vmatpush3.bf16.msra.mxu1 %v4279_v10 }
 0x747   :  { %3919 = vmatprep.subr.bf16.mxu0 %v4280_v12  ;;  %3941 = vmatprep.subr.bf16.mxu1 %v4281_v13 }
 0x74a   :  { %3920 = vmatpush3.bf16.msra.mxu0 %v4282_v14  ;;  %3942 = vmatpush3.bf16.msra.mxu1 %v4283_v15  ;;  %v4306_v14 = vld [vmem:[#allocation10 + $0x100] sm:$0xff]  }
 0x74b   :  { %3921 = vmatprep.subr.bf16.mxu0 %v4284_v16  ;;  %3943 = vmatprep.subr.bf16.mxu1 %v4285_v17  ;;  %v4307_v15 = vld [vmem:[#allocation10 + $0x180] sm:$0xff]   ;;  %v4308_v16 = vld [vmem:[#allocation10 + $0x148] sm:$0xff]  }
 0x74c   :  { %v4309_v17 = vld [vmem:[#allocation10 + $0x1c8] sm:$0xff]  }
 0x74e   :  { %3922 = vmatpush3.bf16.msra.mxu0 %v4286_v18  ;;  %3944 = vmatpush3.bf16.msra.mxu1 %v4287_v49  ;;  %v4310_v18 = vld [vmem:[#allocation10 + $0x108] sm:$0xff]  }
 0x74f   :  { %3923 = vmatprep.subr.bf16.mxu0 %v4288_v19  ;;  %3945 = vmatprep.subr.bf16.mxu1 %v4289_v20  ;;  %v4311_v49 = vld [vmem:[#allocation10 + $0x188] sm:$0xff]   ;;  %v4312_v19 = vld [vmem:[#allocation10 + $0x150] sm:$0xff]  }
 0x750   :  { %v4313_v20 = vld [vmem:[#allocation10 + $0x1d0] sm:$0xff]  }
 0x752   :  { %3924 = vmatpush3.bf16.msra.mxu0 %v4290_v21  ;;  %3946 = vmatpush3.bf16.msra.mxu1 %v4291_v22  ;;  %v4314_v21 = vld [vmem:[#allocation10 + $0x110] sm:$0xff]  }
 0x753   :  { %3925 = vmatprep.subr.bf16.mxu0 %v4292_v25  ;;  %3947 = vmatprep.subr.bf16.mxu1 %v4293_v23  ;;  %v4315_v22 = vld [vmem:[#allocation10 + $0x190] sm:$0xff]   ;;  %v4316_v25 = vld [vmem:[#allocation10 + $0x158] sm:$0xff]  }
 0x754   :  { %v4317_v23 = vld [vmem:[#allocation10 + $0x1d8] sm:$0xff]  }
 0x756   :  { %3926 = vmatpush3.bf16.msra.mxu0 %v4294_v24  ;;  %3948 = vmatpush3.bf16.msra.mxu1 %v4295_v26  ;;  %v4318_v24 = vld [vmem:[#allocation10 + $0x118] sm:$0xff]  }
 0x757   :  { %3927 = vmatprep.subr.bf16.mxu0 %v4296_v27  ;;  %3949 = vmatprep.subr.bf16.mxu1 %v4297_v37  ;;  %v4319_v26 = vld [vmem:[#allocation10 + $0x198] sm:$0xff]   ;;  %v4320_v27 = vld [vmem:[#allocation10 + $0x160] sm:$0xff]  }
 0x758   :  { %v4321_v37 = vld [vmem:[#allocation10 + $0x1e0] sm:$0xff]  }
 0x75a   :  { %3928 = vmatpush3.bf16.msra.mxu0 %v4298_v28  ;;  %3950 = vmatpush3.bf16.msra.mxu1 %v4299_v47  ;;  %v4322_v28 = vld [vmem:[#allocation10 + $0x120] sm:$0xff]  }
 0x75b   :  { %3929 = vmatprep.subr.bf16.mxu0 %v4300_v29  ;;  %3951 = vmatprep.subr.bf16.mxu1 %v4301_v32  ;;  %v4323_v47 = vld [vmem:[#allocation10 + $0x1a0] sm:$0xff]   ;;  %v4324_v29 = vld [vmem:[#allocation10 + $0x168] sm:$0xff]  }
 0x75c   :  { %v4325_v32 = vld [vmem:[#allocation10 + $0x1e8] sm:$0xff]  }
 0x75e   :  { %3930 = vmatpush3.bf16.msra.mxu0 %v4302_v33  ;;  %3952 = vmatpush3.bf16.msra.mxu1 %v4303_v0  ;;  %v1052_v33 = vsub.s32 4, %v4828_v30  ;;  %v1060_v0 = vsub.s32 6, %v4828_v30 }
 0x75f   :  { %3959 = vmatprep.subr.bf16.mxu0 %v4304_v62  ;;  %3981 = vmatprep.subr.bf16.mxu1 %v4305_v63  ;;  %v1056_v62 = vsub.s32 5, %v4828_v30  ;;  %v1064_v63 = vsub.s32 7, %v4828_v30 }
 0x7b4   :  { %v1788_v60 = vpop.f32.mrb[16].mxu0  ;;  %v1831_v8 = vpop.f32.mrb[16].mxu1 }
 0x7b5   :  { %v1789_v9 = vadd.f32 %v1788_v60, %v1037_v38  ;;  %v1832_v42 = vadd.f32 %v1831_v8, %v1045_v39  ;;  %v1790_v43 = vpop.f32.mrb[17].mxu0  ;;  %v1833_v44 = vpop.f32.mrb[17].mxu1  ;;  %v4328_v60 = vld [vmem:[#allocation10 + $0x170] sm:$0xff]  }
 0x7b6   :  { %v1791_v45 = vadd.f32 %v1790_v43, %v1041_v40  ;;  %v1834_v51 = vadd.f32 %v1833_v44, %v1049_v41  ;;  %v1792_v52 = vpop.f32.mrb[18].mxu0  ;;  %v1835_v48 = vpop.f32.mrb[18].mxu1  ;;  %v4329_v8 = vld [vmem:[#allocation10 + $0x1f0] sm:$0xff]  }
 0x7b7   :  { %v1793_v53 = vadd.f32 %v1792_v52, %v1037_v38  ;;  %v1836_v54 = vadd.f32 %v1835_v48, %v1045_v39  ;;  %v1794_v55 = vpop.f32.mrb[19].mxu0  ;;  %v1837_v56 = vpop.f32.mrb[19].mxu1  ;;  %v2098_v59 = vmax.f32 %v1789_v9, 0.0  ;;  %v2100_v1 = vmax.f32 %v1832_v42, 0.0  ;;  %v4326_v38 = vld [vmem:[#allocation10 + $0x128] sm:$0xff]  }
 0x7b8   :  { %v1795_v57 = vadd.f32 %v1794_v55, %v1041_v40  ;;  %v1838_v58 = vadd.f32 %v1837_v56, %v1049_v41  ;;  %v2099_v3 = vmax.f32 %v1791_v45, 0.0  ;;  %v2101_v4 = vmax.f32 %v1834_v51, 0.0  ;;  %v4327_v39 = vld [vmem:[#allocation10 + $0x1a8] sm:$0xff]   ;;  %v4330_v45 = vld [vmem:[#allocation10 + $0x130] sm:$0xff]   ;;  %v4332_v55 = vld [vmem:[#allocation10 + $0x178] sm:$0xff]  }
 0x7b9   :  { %v2114_v61 = vmax.f32 %v1793_v53, 0.0  ;;  %v2116_v2 = vmax.f32 %v1836_v54, 0.0  ;;  %v1053_v40 = vrot.slane %v4985_v34, %v1052_v33  ;;  %v1061_v41 = vrot.slane %v4985_v34, %v1060_v0  ;;  %v4331_v51 = vld [vmem:[#allocation10 + $0x1b0] sm:$0xff]   ;;  %v4333_v56 = vld [vmem:[#allocation10 + $0x1f8] sm:$0xff]  }
 0x7ba   :  { %v2115_v5 = vmax.f32 %v1795_v57, 0.0  ;;  %v2117_v6 = vmax.f32 %v1838_v58, 0.0  ;;  %v1057_v9 = vrot.slane %v4985_v34, %v1056_v62  ;;  %v1065_v42 = vrot.slane %v4985_v34, %v1064_v63 }
 0x7bb   :  { %v2130_v7 = vpack.c.bf16 %v2114_v61, %v2098_v59  ;;  %v2132_v10 = vpack.c.bf16 %v2116_v2, %v2100_v1 }
 0x7bc   :  { %v2131_v12 = vpack.c.bf16 %v2115_v5, %v2099_v3  ;;  %v2133_v13 = vpack.c.bf16 %v2117_v6, %v2101_v4  ;;  %v4334_v6 = vld [vmem:[#allocation10 + $0x138] sm:$0xff]  }
 0x7be   :  { %3209 = vmatprep.mubr.bf16.mxu0 %v2131_v12  ;;  %3250 = vmatprep.mubr.bf16.mxu1 %v2133_v13 }
 0x7bf   :  { %3210 = vmatmul.mubr.bf16.vlgmr.msra.gmra.mrb[32].mxu0 %v2130_v7  ;;  %3251 = vmatmul.mubr.bf16.vlgmr.msra.gmra.mrb[32].mxu1 %v2132_v10  ;;  %v4335_v7 = vld [vmem:[#allocation10 + $0x1b8] sm:$0xff]  }
 0x7c0   :  { %3960 = vmatpush3.bf16.msra.mxu0 %v4306_v14  ;;  %3982 = vmatpush3.bf16.msra.mxu1 %v4307_v15  ;;  %v4336_v15 = vld [vmem:[#allocation10 + $0x240] sm:$0xff]  }
 0x7c1   :  { %3961 = vmatprep.subr.bf16.mxu0 %v4308_v16  ;;  %3983 = vmatprep.subr.bf16.mxu1 %v4309_v17  ;;  %v4337_v16 = vld [vmem:[#allocation10 + $0x2c0] sm:$0xff]  }
 0x7c4   :  { %3962 = vmatpush3.bf16.msra.mxu0 %v4310_v18  ;;  %3984 = vmatpush3.bf16.msra.mxu1 %v4311_v49 }
 0x7c5   :  { %3963 = vmatprep.subr.bf16.mxu0 %v4312_v19  ;;  %3985 = vmatprep.subr.bf16.mxu1 %v4313_v20 }
 0x7c8   :  { %3964 = vmatpush3.bf16.msra.mxu0 %v4314_v21  ;;  %3986 = vmatpush3.bf16.msra.mxu1 %v4315_v22 }
 0x7c9   :  { %3965 = vmatprep.subr.bf16.mxu0 %v4316_v25  ;;  %3987 = vmatprep.subr.bf16.mxu1 %v4317_v23  ;;  %v4338_v23 = vld [vmem:[#allocation10 + $0x200] sm:$0xff]  }
 0x7cc   :  { %3966 = vmatpush3.bf16.msra.mxu0 %v4318_v24  ;;  %3988 = vmatpush3.bf16.msra.mxu1 %v4319_v26  ;;  %v4339_v24 = vld [vmem:[#allocation10 + $0x280] sm:$0xff]   ;;  %v4340_v26 = vld [vmem:[#allocation10 + $0x248] sm:$0xff]  }
 0x7cd   :  { %3967 = vmatprep.subr.bf16.mxu0 %v4320_v27  ;;  %3989 = vmatprep.subr.bf16.mxu1 %v4321_v37  ;;  %v4341_v27 = vld [vmem:[#allocation10 + $0x2c8] sm:$0xff]  }
 0x7ce   :  { %v4342_v37 = vld [vmem:[#allocation10 + $0x208] sm:$0xff]  }
 0x7d0   :  { %3968 = vmatpush3.bf16.msra.mxu0 %v4322_v28  ;;  %3990 = vmatpush3.bf16.msra.mxu1 %v4323_v47  ;;  %v4343_v28 = vld [vmem:[#allocation10 + $0x288] sm:$0xff]   ;;  %v4344_v47 = vld [vmem:[#allocation10 + $0x250] sm:$0xff]  }
 0x7d1   :  { %3969 = vmatprep.subr.bf16.mxu0 %v4324_v29  ;;  %3991 = vmatprep.subr.bf16.mxu1 %v4325_v32  ;;  %v4345_v29 = vld [vmem:[#allocation10 + $0x2d0] sm:$0xff]  }
 0x7d2   :  { %v4346_v32 = vld [vmem:[#allocation10 + $0x210] sm:$0xff]  }
 0x7d4   :  { %v1874_v43 = vpop.f32.mrb[20].mxu0  ;;  %v1917_v44 = vpop.f32.mrb[20].mxu1  ;;  %3970 = vmatpush3.bf16.msra.mxu0 %v4326_v38  ;;  %3992 = vmatpush3.bf16.msra.mxu1 %v4327_v39  ;;  %v4347_v38 = vld [vmem:[#allocation10 + $0x290] sm:$0xff]   ;;  %v4348_v39 = vld [vmem:[#allocation10 + $0x258] sm:$0xff]  }
 0x7d5   :  { %v1875_v52 = vadd.f32 %v1874_v43, %v1053_v40  ;;  %v1918_v48 = vadd.f32 %v1917_v44, %v1061_v41  ;;  %v1876_v53 = vpop.f32.mrb[21].mxu0  ;;  %v1919_v54 = vpop.f32.mrb[21].mxu1  ;;  %3971 = vmatprep.subr.bf16.mxu0 %v4328_v60  ;;  %3993 = vmatprep.subr.bf16.mxu1 %v4329_v8  ;;  %v4351_v60 = vld [vmem:[#allocation10 + $0x298] sm:$0xff]   ;;  %v4352_v8 = vld [vmem:[#allocation10 + $0x260] sm:$0xff]   ;;  %v4356_v44 = vld [vmem:[#allocation10 + $0x268] sm:$0xff]  }
 0x7d6   :  { %v1877_v57 = vadd.f32 %v1876_v53, %v1057_v9  ;;  %v1920_v58 = vadd.f32 %v1919_v54, %v1065_v42  ;;  %v1878_v59 = vpop.f32.mrb[22].mxu0  ;;  %v1921_v1 = vpop.f32.mrb[22].mxu1  ;;  %v4355_v43 = vld [vmem:[#allocation10 + $0x2a0] sm:$0xff]  }
 0x7d7   :  { %v1879_v61 = vadd.f32 %v1878_v59, %v1053_v40  ;;  %v1922_v34 = vadd.f32 %v1921_v1, %v1061_v41  ;;  %v1880_v2 = vpop.f32.mrb[23].mxu0  ;;  %v1923_v3 = vpop.f32.mrb[23].mxu1  ;;  %v2102_v10 = vmax.f32 %v1875_v52, 0.0  ;;  %v2104_v12 = vmax.f32 %v1918_v48, 0.0  ;;  %v4349_v40 = vld [vmem:[#allocation10 + $0x2d8] sm:$0xff]   ;;  %v4358_v52 = vld [vmem:[#allocation10 + $0x228] sm:$0xff]  }
 0x7d8   :  { %v1881_v4 = vadd.f32 %v1880_v2, %v1057_v9  ;;  %v1924_v5 = vadd.f32 %v1923_v3, %v1065_v42  ;;  %3972 = vmatpush3.bf16.msra.mxu0 %v4330_v45  ;;  %3994 = vmatpush3.bf16.msra.mxu1 %v4331_v51  ;;  %v2103_v17 = vmax.f32 %v1877_v57, 0.0  ;;  %v2105_v18 = vmax.f32 %v1920_v58, 0.0  ;;  %v4350_v41 = vld [vmem:[#allocation10 + $0x218] sm:$0xff]   ;;  %v4353_v9 = vld [vmem:[#allocation10 + $0x2e0] sm:$0xff]   ;;  %v4357_v45 = vld [vmem:[#allocation10 + $0x2e8] sm:$0xff]  }
 0x7d9   :  { %v2118_v13 = vmax.f32 %v1879_v61, 0.0  ;;  %v2120_v14 = vmax.f32 %v1922_v34, 0.0  ;;  %3973 = vmatprep.subr.bf16.mxu0 %v4332_v55  ;;  %3995 = vmatprep.subr.bf16.mxu1 %v4333_v56  ;;  %v4354_v42 = vld [vmem:[#allocation10 + $0x220] sm:$0xff]   ;;  %v5016_v51 = vld [vmem:[%s5073_s8 + $0x8] sm:$0xff]  ;;  %v4359_v48 = vld [vmem:[#allocation10 + $0x2a8] sm:$0xff]  }
 0x7da   :  { %v2119_v49 = vmax.f32 %v1881_v4, 0.0  ;;  %v2121_v19 = vmax.f32 %v1924_v5, 0.0  ;;  %v1069_v53 = vrot.slane %v5016_v51, %v4876_v11  ;;  %v1077_v54 = vrot.slane %v5016_v51, %v4850_v50  ;;  %v4360_v55 = vld [vmem:[#allocation10 + $0x270] sm:$0xff]   ;;  %v4364_v50 = vld [vmem:[#allocation10 + $0x278] sm:$0xff]  }
 0x7db   :  { %v2134_v20 = vpack.c.bf16 %v2118_v13, %v2102_v10  ;;  %v2136_v21 = vpack.c.bf16 %v2120_v14, %v2104_v12  ;;  %v4361_v56 = vld [vmem:[#allocation10 + $0x2f0] sm:$0xff]   ;;  %v1073_v57 = vrot.slane %v5016_v51, %v4831_v31  ;;  %v1081_v58 = vrot.slane %v5016_v51, %v1048_v35  ;;  %v4365_v5 = vld [vmem:[#allocation10 + $0x2f8] sm:$0xff]  }
 0x7dc   :  { %v2135_v22 = vpack.c.bf16 %v2119_v49, %v2103_v17  ;;  %v2137_v25 = vpack.c.bf16 %v2121_v19, %v2105_v18  ;;  %3974 = vmatpush3.bf16.msra.mxu0 %v4334_v6  ;;  %3996 = vmatpush3.bf16.msra.mxu1 %v4335_v7  ;;  %v4362_v61 = vld [vmem:[#allocation10 + $0x230] sm:$0xff]   ;;  %v4366_v17 = vld [vmem:[#allocation10 + $0x238] sm:$0xff]  }
 0x7dd   :  { %4003 = vmatprep.subr.bf16.mxu0 %v4336_v15  ;;  %4025 = vmatprep.subr.bf16.mxu1 %v4337_v16  ;;  %v4363_v34 = vld [vmem:[#allocation10 + $0x2b0] sm:$0xff]   ;;  %v4367_v18 = vld [vmem:[#allocation10 + $0x2b8] sm:$0xff]  }
 0x7de   :  { %3291 = vmatprep.mubr.bf16.mxu0 %v2135_v22  ;;  %3332 = vmatprep.mubr.bf16.mxu1 %v2137_v25  ;;  %v4368_v22 = vld [vmem:[#allocation10 + $0x340] sm:$0xff]  }
 0x7df   :  { %3292 = vmatmul.mubr.bf16.vlgmr.msra.gmra.mrb[36].mxu0 %v2134_v20  ;;  %3333 = vmatmul.mubr.bf16.vlgmr.msra.gmra.mrb[36].mxu1 %v2136_v21  ;;  %v4369_v25 = vld [vmem:[#allocation10 + $0x3c0] sm:$0xff]  }
 0x7e0   :  { %4004 = vmatpush3.bf16.msra.mxu0 %v4338_v23  ;;  %4026 = vmatpush3.bf16.msra.mxu1 %v4339_v24 }
 0x7e1   :  { %4005 = vmatprep.subr.bf16.mxu0 %v4340_v26  ;;  %4027 = vmatprep.subr.bf16.mxu1 %v4341_v27 }
 0x7e4   :  { %4006 = vmatpush3.bf16.msra.mxu0 %v4342_v37  ;;  %4028 = vmatpush3.bf16.msra.mxu1 %v4343_v28 }
 0x7e5   :  { %4007 = vmatprep.subr.bf16.mxu0 %v4344_v47  ;;  %4029 = vmatprep.subr.bf16.mxu1 %v4345_v29 }
 0x7e8   :  { %4008 = vmatpush3.bf16.msra.mxu0 %v4346_v32  ;;  %4030 = vmatpush3.bf16.msra.mxu1 %v4347_v38  ;;  %v4370_v32 = vld [vmem:[#allocation10 + $0x300] sm:$0xff]  }
 0x7e9   :  { %4009 = vmatprep.subr.bf16.mxu0 %v4348_v39  ;;  %4031 = vmatprep.subr.bf16.mxu1 %v4349_v40  ;;  %v4371_v38 = vld [vmem:[#allocation10 + $0x380] sm:$0xff]   ;;  %v4372_v39 = vld [vmem:[#allocation10 + $0x348] sm:$0xff]  }
 0x7ea   :  { %v4373_v40 = vld [vmem:[#allocation10 + $0x3c8] sm:$0xff]  }
 0x7ec   :  { %4010 = vmatpush3.bf16.msra.mxu0 %v4350_v41  ;;  %4032 = vmatpush3.bf16.msra.mxu1 %v4351_v60  ;;  %v4374_v41 = vld [vmem:[#allocation10 + $0x308] sm:$0xff]  }
 0x7ed   :  { %4011 = vmatprep.subr.bf16.mxu0 %v4352_v8  ;;  %4033 = vmatprep.subr.bf16.mxu1 %v4353_v9  ;;  %v4375_v60 = vld [vmem:[#allocation10 + $0x388] sm:$0xff]   ;;  %v4376_v8 = vld [vmem:[#allocation10 + $0x350] sm:$0xff]  }
 0x7ee   :  { %v4377_v9 = vld [vmem:[#allocation10 + $0x3d0] sm:$0xff]  }
 0x7f0   :  { %4012 = vmatpush3.bf16.msra.mxu0 %v4354_v42  ;;  %4034 = vmatpush3.bf16.msra.mxu1 %v4355_v43  ;;  %v4378_v42 = vld [vmem:[#allocation10 + $0x310] sm:$0xff]  }
 0x7f1   :  { %4013 = vmatprep.subr.bf16.mxu0 %v4356_v44  ;;  %4035 = vmatprep.subr.bf16.mxu1 %v4357_v45  ;;  %v4379_v43 = vld [vmem:[#allocation10 + $0x390] sm:$0xff]   ;;  %v4380_v44 = vld [vmem:[#allocation10 + $0x358] sm:$0xff]  }
 0x7f2   :  { %v4381_v45 = vld [vmem:[#allocation10 + $0x3d8] sm:$0xff]  }
 0x7f4   :  { %v1960_v59 = vpop.f32.mrb[24].mxu0  ;;  %v2003_v1 = vpop.f32.mrb[24].mxu1  ;;  %4014 = vmatpush3.bf16.msra.mxu0 %v4358_v52  ;;  %4036 = vmatpush3.bf16.msra.mxu1 %v4359_v48  ;;  %v4382_v52 = vld [vmem:[#allocation10 + $0x318] sm:$0xff]  }
 0x7f5   :  { %v1961_v2 = vadd.f32 %v1960_v59, %v1069_v53  ;;  %v2004_v11 = vadd.f32 %v2003_v1, %v1077_v54  ;;  %v1962_v3 = vpop.f32.mrb[25].mxu0  ;;  %v2005_v4 = vpop.f32.mrb[25].mxu1  ;;  %4015 = vmatprep.subr.bf16.mxu0 %v4360_v55  ;;  %4037 = vmatprep.subr.bf16.mxu1 %v4361_v56  ;;  %v4383_v48 = vld [vmem:[#allocation10 + $0x398] sm:$0xff]   ;;  %v4386_v55 = vld [vmem:[#allocation10 + $0x320] sm:$0xff]   ;;  %v4390_v59 = vld [vmem:[#allocation10 + $0x328] sm:$0xff]  }
 0x7f6   :  { %v1963_v6 = vadd.f32 %v1962_v3, %v1073_v57  ;;  %v2006_v31 = vadd.f32 %v2005_v4, %v1081_v58  ;;  %v1964_v7 = vpop.f32.mrb[26].mxu0  ;;  %v2007_v10 = vpop.f32.mrb[26].mxu1  ;;  %v4387_v56 = vld [vmem:[#allocation10 + $0x3a0] sm:$0xff]   ;;  %v4391_v1 = vld [vmem:[#allocation10 + $0x3a8] sm:$0xff]   ;;  %v1089_v3 = vrot.slane %v5016_v51, %v1056_v62  ;;  %v1097_v4 = vrot.slane %v5016_v51, %v1064_v63 }
 0x7f7   :  { %v1965_v12 = vadd.f32 %v1964_v7, %v1069_v53  ;;  %v2008_v35 = vadd.f32 %v2007_v10, %v1077_v54  ;;  %v1966_v13 = vpop.f32.mrb[27].mxu0  ;;  %v2009_v14 = vpop.f32.mrb[27].mxu1  ;;  %v2106_v49 = vmax.f32 %v1961_v2, 0.0  ;;  %v2108_v19 = vmax.f32 %v2004_v11, 0.0  ;;  %v4384_v53 = vld [vmem:[#allocation10 + $0x360] sm:$0xff]   ;;  %v4392_v2 = vld [vmem:[#allocation10 + $0x370] sm:$0xff]  }
 0x7f8   :  { %v1967_v15 = vadd.f32 %v1966_v13, %v1073_v57  ;;  %v2010_v16 = vadd.f32 %v2009_v14, %v1081_v58  ;;  %4016 = vmatpush3.bf16.msra.mxu0 %v4362_v61  ;;  %4038 = vmatpush3.bf16.msra.mxu1 %v4363_v34  ;;  %v2107_v23 = vmax.f32 %v1963_v6, 0.0  ;;  %v2109_v24 = vmax.f32 %v2006_v31, 0.0  ;;  %v4385_v54 = vld [vmem:[#allocation10 + $0x3e0] sm:$0xff]   ;;  %v4388_v57 = vld [vmem:[#allocation10 + $0x368] sm:$0xff]   ;;  %v4393_v11 = vld [vmem:[#allocation10 + $0x3f0] sm:$0xff]  }
 0x7f9   :  { %v2122_v20 = vmax.f32 %v1965_v12, 0.0  ;;  %v2124_v21 = vmax.f32 %v2008_v35, 0.0  ;;  %4017 = vmatprep.subr.bf16.mxu0 %v4364_v50  ;;  %4039 = vmatprep.subr.bf16.mxu1 %v4365_v5  ;;  %v4389_v58 = vld [vmem:[#allocation10 + $0x3e8] sm:$0xff]   ;;  %v1085_v61 = vrot.slane %v5016_v51, %v1052_v33  ;;  %v1093_v34 = vrot.slane %v5016_v51, %v1060_v0  ;;  %v4394_v6 = vld [vmem:[#allocation10 + $0x330] sm:$0xff]   ;;  %v4396_v12 = vld [vmem:[#allocation10 + $0x378] sm:$0xff]  }
 0x7fa   :  { %v2123_v26 = vmax.f32 %v1967_v15, 0.0  ;;  %v2125_v27 = vmax.f32 %v2010_v16, 0.0  ;;  %v4395_v33 = vld [vmem:[#allocation10 + $0x3b0] sm:$0xff]   ;;  %v4397_v35 = vld [vmem:[#allocation10 + $0x3f8] sm:$0xff]  }
 0x7fb   :  { %v2138_v37 = vpack.c.bf16 %v2122_v20, %v2106_v49  ;;  %v2140_v28 = vpack.c.bf16 %v2124_v21, %v2108_v19  ;;  %v4398_v49 = vld [vmem:[#allocation10 + $0x338] sm:$0xff]  }
 0x7fc   :  { %v2139_v47 = vpack.c.bf16 %v2123_v26, %v2107_v23  ;;  %v2141_v29 = vpack.c.bf16 %v2125_v27, %v2109_v24  ;;  %4018 = vmatpush3.bf16.msra.mxu0 %v4366_v17  ;;  %4040 = vmatpush3.bf16.msra.mxu1 %v4367_v18  ;;  %v4399_v19 = vld [vmem:[#allocation10 + $0x3b8] sm:$0xff]  }
 0x7fd   :  { %4047 = vmatprep.subr.bf16.mxu0 %v4368_v22  ;;  %4069 = vmatprep.subr.bf16.mxu1 %v4369_v25 }
 0x7fe   :  { %3373 = vmatprep.mubr.bf16.mxu0 %v2139_v47  ;;  %3414 = vmatprep.mubr.bf16.mxu1 %v2141_v29 }
 0x7ff   :  { %3374 = vmatmul.mubr.bf16.vlgmr.msra.gmra.mrb[40].mxu0 %v2138_v37  ;;  %3415 = vmatmul.mubr.bf16.vlgmr.msra.gmra.mrb[40].mxu1 %v2140_v28 }
 0x800   :  { %4048 = vmatpush3.bf16.msra.mxu0 %v4370_v32  ;;  %4070 = vmatpush3.bf16.msra.mxu1 %v4371_v38 }
 0x801   :  { %4049 = vmatprep.subr.bf16.mxu0 %v4372_v39  ;;  %4071 = vmatprep.subr.bf16.mxu1 %v4373_v40  ;;  %v3736_v39 = vld [vmem:[%s5075_s10] ss:$0 sm:$0xff] }
 0x804   :  { %4050 = vmatpush3.bf16.msra.mxu0 %v4374_v41  ;;  %4072 = vmatpush3.bf16.msra.mxu1 %v4375_v60 }
 0x805   :  { %4051 = vmatprep.subr.bf16.mxu0 %v4376_v8  ;;  %4073 = vmatprep.subr.bf16.mxu1 %v4377_v9 }
 0x808   :  { %4052 = vmatpush3.bf16.msra.mxu0 %v4378_v42  ;;  %4074 = vmatpush3.bf16.msra.mxu1 %v4379_v43 }
 0x809   :  { %4053 = vmatprep.subr.bf16.mxu0 %v4380_v44  ;;  %4075 = vmatprep.subr.bf16.mxu1 %v4381_v45 }
 0x80c   :  { %4054 = vmatpush3.bf16.msra.mxu0 %v4382_v52  ;;  %4076 = vmatpush3.bf16.msra.mxu1 %v4383_v48 }
 0x80d   :  { %4055 = vmatprep.subr.bf16.mxu0 %v4384_v53  ;;  %4077 = vmatprep.subr.bf16.mxu1 %v4385_v54 }
 0x810   :  { %4056 = vmatpush3.bf16.msra.mxu0 %v4386_v55  ;;  %4078 = vmatpush3.bf16.msra.mxu1 %v4387_v56 }
 0x811   :  { %4057 = vmatprep.subr.bf16.mxu0 %v4388_v57  ;;  %4079 = vmatprep.subr.bf16.mxu1 %v4389_v58 }
 0x814   :  { %v2046_v50 = vpop.f32.mrb[28].mxu0  ;;  %v2089_v5 = vpop.f32.mrb[28].mxu1  ;;  %4058 = vmatpush3.bf16.msra.mxu0 %v4390_v59  ;;  %4080 = vmatpush3.bf16.msra.mxu1 %v4391_v1 }
 0x815   :  { %v2047_v31 = vadd.f32 %v2046_v50, %v1085_v61  ;;  %v2090_v7 = vadd.f32 %v2089_v5, %v1093_v34  ;;  %v2048_v10 = vpop.f32.mrb[29].mxu0  ;;  %v2091_v0 = vpop.f32.mrb[29].mxu1  ;;  %4059 = vmatprep.subr.bf16.mxu0 %v4392_v2  ;;  %4081 = vmatprep.subr.bf16.mxu1 %v4393_v11 }
 0x816   :  { %v2049_v13 = vadd.f32 %v2048_v10, %v1089_v3  ;;  %v2092_v62 = vadd.f32 %v2091_v0, %v1097_v4  ;;  %v2050_v14 = vpop.f32.mrb[30].mxu0  ;;  %v2093_v30 = vpop.f32.mrb[30].mxu1 }
 0x817   :  { %v2051_v15 = vadd.f32 %v2050_v14, %v1085_v61  ;;  %v2094_v63 = vadd.f32 %v2093_v30, %v1093_v34  ;;  %v2052_v51 = vpop.f32.mrb[31].mxu0  ;;  %v2095_v16 = vpop.f32.mrb[31].mxu1  ;;  %v2110_v20 = vmax.f32 %v2047_v31, 0.0  ;;  %v2112_v21 = vmax.f32 %v2090_v7, 0.0 }
 0x818   :  { %v2053_v17 = vadd.f32 %v2052_v51, %v1089_v3  ;;  %v2096_v18 = vadd.f32 %v2095_v16, %v1097_v4  ;;  %4060 = vmatpush3.bf16.msra.mxu0 %v4394_v6  ;;  %4082 = vmatpush3.bf16.msra.mxu1 %v4395_v33  ;;  %v2111_v23 = vmax.f32 %v2049_v13, 0.0  ;;  %v2113_v24 = vmax.f32 %v2092_v62, 0.0 }
 0x819   :  { %v2126_v22 = vmax.f32 %v2051_v15, 0.0  ;;  %v2128_v25 = vmax.f32 %v2094_v63, 0.0  ;;  %4061 = vmatprep.subr.bf16.mxu0 %v4396_v12  ;;  %4083 = vmatprep.subr.bf16.mxu1 %v4397_v35 }
 0x81a   :  { %v2127_v26 = vmax.f32 %v2053_v17, 0.0  ;;  %v2129_v27 = vmax.f32 %v2096_v18, 0.0 }
 0x81b   :  { %v2142_v37 = vpack.c.bf16 %v2126_v22, %v2110_v20  ;;  %v2144_v28 = vpack.c.bf16 %v2128_v25, %v2112_v21 }
 0x81c   :  { %v2143_v47 = vpack.c.bf16 %v2127_v26, %v2111_v23  ;;  %v2145_v29 = vpack.c.bf16 %v2129_v27, %v2113_v24  ;;  %4062 = vmatpush3.bf16.msra.mxu0 %v4398_v49  ;;  %4084 = vmatpush3.bf16.msra.mxu1 %v4399_v19 }
 0x81e   :  { %3455 = vmatprep.mubr.bf16.mxu0 %v2143_v47  ;;  %3496 = vmatprep.mubr.bf16.mxu1 %v2145_v29 }
 0x81f   :  { %3456 = vmatmul.mubr.bf16.vlgmr.msra.gmra.mrb[44].mxu0 %v2142_v37  ;;  %3497 = vmatmul.mubr.bf16.vlgmr.msra.gmra.mrb[44].mxu1 %v2144_v28 }
 0x892   :  { %v3931_v32 = vpop.f32.mrb[32].mxu0  ;;  %v3953_v38 = vpop.f32.mrb[32].mxu1 }
 0x893   :  { %v3932_v40 = vpop.f32.mrb[33].mxu0  ;;  %v3954_v41 = vpop.f32.mrb[33].mxu1 }
 0x894   :  { %v3933_v60 = vadd.f32 %v3932_v40, %v3931_v32  ;;  %v3955_v8 = vadd.f32 %v3954_v41, %v3953_v38  ;;  %v3934_v9 = vpop.f32.mrb[34].mxu0  ;;  %v3956_v42 = vpop.f32.mrb[34].mxu1 }
 0x895   :  { %v3935_v43 = vpop.f32.mrb[35].mxu0  ;;  %v3957_v44 = vpop.f32.mrb[35].mxu1 }
 0x896   :  { %v3212_v45 = vadd.f32 %v3933_v60, %v3736_v39  ;;  %v3936_v52 = vadd.f32 %v3935_v43, %v3934_v9  ;;  %v3958_v48 = vadd.f32 %v3957_v44, %v3956_v42 }
 0x898   :  { %v3253_v53 = vadd.f32 %v3955_v8, %v3212_v45  ;;  %v3215_v54 = vadd.f32 %v3936_v52, %v3736_v39 }
 0x89a   :  { %v3256_v55 = vadd.f32 %v3958_v48, %v3215_v54 }
 0x8b2   :  { %v3975_v56 = vpop.f32.mrb[36].mxu0  ;;  %v3997_v57 = vpop.f32.mrb[36].mxu1 }
 0x8b3   :  { %v3976_v58 = vpop.f32.mrb[37].mxu0  ;;  %v3998_v59 = vpop.f32.mrb[37].mxu1 }
 0x8b4   :  { %v3977_v1 = vadd.f32 %v3976_v58, %v3975_v56  ;;  %v3999_v61 = vadd.f32 %v3998_v59, %v3997_v57  ;;  %v3978_v34 = vpop.f32.mrb[38].mxu0  ;;  %v4000_v2 = vpop.f32.mrb[38].mxu1  ;;  %v3865_v57 = vld [vmem:[%s5076_s11] ss:$0 sm:$0xff] }
 0x8b5   :  { %v3979_v11 = vpop.f32.mrb[39].mxu0  ;;  %v4001_v3 = vpop.f32.mrb[39].mxu1 }
 0x8b6   :  { %v3294_v4 = vadd.f32 %v3977_v1, %v3253_v53  ;;  %v3980_v50 = vadd.f32 %v3979_v11, %v3978_v34  ;;  %v4002_v5 = vadd.f32 %v4001_v3, %v4000_v2  ;;  %v3866_v1 = vld [vmem:[%s5077_s12] ss:$0 sm:$0xff] }
 0x8b8   :  { %v3335_v6 = vadd.f32 %v3999_v61, %v3294_v4  ;;  %v3297_v33 = vadd.f32 %v3980_v50, %v3256_v55 }
 0x8ba   :  { %v3338_v31 = vadd.f32 %v4002_v5, %v3297_v33 }
 0x8d2   :  { %v4019_v7 = vpop.f32.mrb[40].mxu0  ;;  %v4041_v10 = vpop.f32.mrb[40].mxu1 }
 0x8d3   :  { %v4020_v0 = vpop.f32.mrb[41].mxu0  ;;  %v4042_v12 = vpop.f32.mrb[41].mxu1 }
 0x8d4   :  { %v4021_v35 = vadd.f32 %v4020_v0, %v4019_v7  ;;  %v4043_v13 = vadd.f32 %v4042_v12, %v4041_v10  ;;  %v4022_v62 = vpop.f32.mrb[42].mxu0  ;;  %v4044_v14 = vpop.f32.mrb[42].mxu1 }
 0x8d5   :  { %v4023_v30 = vpop.f32.mrb[43].mxu0  ;;  %v4045_v15 = vpop.f32.mrb[43].mxu1 }
 0x8d6   :  { %v3376_v63 = vadd.f32 %v4021_v35, %v3335_v6  ;;  %v4024_v51 = vadd.f32 %v4023_v30, %v4022_v62  ;;  %v4046_v16 = vadd.f32 %v4045_v15, %v4044_v14 }
 0x8d8   :  { %v3417_v17 = vadd.f32 %v4043_v13, %v3376_v63  ;;  %v3379_v18 = vadd.f32 %v4024_v51, %v3338_v31 }
 0x8da   :  { %v3420_v49 = vadd.f32 %v4046_v16, %v3379_v18 }
 0x8f2   :  { %v4063_v19 = vpop.f32.mrb[44].mxu0  ;;  %v4085_v20 = vpop.f32.mrb[44].mxu1 }
 0x8f3   :  { %v4064_v21 = vpop.f32.mrb[45].mxu0  ;;  %v4086_v22 = vpop.f32.mrb[45].mxu1 }
 0x8f4   :  { %v4065_v25 = vadd.f32 %v4064_v21, %v4063_v19  ;;  %v4087_v23 = vadd.f32 %v4086_v22, %v4085_v20  ;;  %v4066_v24 = vpop.f32.mrb[46].mxu0  ;;  %v4088_v26 = vpop.f32.mrb[46].mxu1 }
 0x8f5   :  { %v4067_v27 = vpop.f32.mrb[47].mxu0  ;;  %v4089_v37 = vpop.f32.mrb[47].mxu1 }
 0x8f6   :  { %v3458_v28 = vadd.f32 %v4065_v25, %v3417_v17  ;;  %v4068_v47 = vadd.f32 %v4067_v27, %v4066_v24  ;;  %v4090_v29 = vadd.f32 %v4089_v37, %v4088_v26 }
 0x8f8   :  { %v3499_v32 = vadd.f32 %v4087_v23, %v3458_v28  ;;  %v3461_v38 = vadd.f32 %v4068_v47, %v3420_v49 }
 0x8fa   :  { %v3502_v39 = vadd.f32 %v4090_v29, %v3461_v38  ;;  %v3505_v40 = vadd.f32 %v3499_v32, %v4960_v46 }
 0x8fc   :  { %3507 = vadd.xlane.f32.xlu0 %v3505_v40  ;;  %v3506_v41 = vadd.f32 %v3502_v39, %v4962_v36 }
 0x8fe   :  { %3509 = vadd.xlane.f32.xlu1 %v3506_v41 }
 0x989   :  { %v3508_v60 = vpop.xlane.xlu0 %3507 }
 0x98a   :  { %v3511_v8 = vmul.f32 0.0078125, %v3508_v60 }
 0x98b   :  { %v3510_v9 = vpop.xlane.xlu1 %3509 }
 0x98c   :  { %v3513_v42 = vsub.f32 %v3505_v40, %v3511_v8  ;;  %v3512_v43 = vmul.f32 0.0078125, %v3510_v9 }
 0x98e   :  { %v3514_v44 = vsub.f32 %v3506_v41, %v3512_v43  ;;  %v3515_v45 = vmul.f32 %v3513_v42, %v3513_v42 }
 0x990   :  { %3517 = vadd.xlane.f32.xlu0 %v3515_v45  ;;  %v3516_v52 = vmul.f32 %v3514_v44, %v3514_v44 }
 0x992   :  { %3519 = vadd.xlane.f32.xlu1 %v3516_v52 }
 0xa1d   :  { %v3518_v48 = vpop.xlane.xlu0 %3517 }
 0xa1e   :  { %v3521_v53 = vmul.f32 0.0078125, %v3518_v48 }
 0xa1f   :  { %v3520_v54 = vpop.xlane.xlu1 %3519 }
 0xa20   :  { %v3523_v55 = vadd.f32 1e-05, %v3521_v53  ;;  %v3522_v56 = vmul.f32 0.0078125, %v3520_v54 }
 0xa22   :  { %4412 = vrsqrt.f32 %v3523_v55  ;;  %v3524_v46 = vadd.f32 1e-05, %v3522_v56 }
 0xa24   :  { %4414 = vrsqrt.f32 %v3524_v46 }
 0xa2c   :  { %v4413_v36 = vpop.eup %4412 }
 0xa2d   :  { %v3527_v58 = vmul.f32 %v4413_v36, %v3513_v42 }
 0xa2e   :  { %v4415_v59 = vpop.eup %4414 }
 0xa2f   :  { %v3528_v61 = vmul.f32 %v4415_v59, %v3514_v44  ;;  %v3536_v34 = vmul.f32 %v3865_v57, %v3527_v58 }
 0xa31   :  { %v3537_v2 = vmul.f32 %v3865_v57, %v3528_v61  ;;  %v3545_v11 = vadd.f32 %v3866_v1, %v3536_v34 }
 0xa33   :  { %v3546_v3 = vadd.f32 %v3866_v1, %v3537_v2  ;;  %3547 = vst [vmem:[#allocation14] sm:$0xff] %v3545_v11 }
 0xa35   :  { %3548 = vst [vmem:[#allocation14 + $0x8] sm:$0xff] %v3546_v3 }
 0xa36   :  { %4581 = shalt.err (!%p4578_p4)
}
 0xa37   :  { %s4582_s12 = scalar_lea.hbm %s5080_s15, 256 }
 0xa38   :  { %p4583_p5 = scmp.ne.s32.totalorder %s5080_s15, %s4582_s12  ;;  %p4586_p6 = scmp.lt.u32.totalorder %s4582_s12, %s5080_s15 }
 0xa3a   :  { %p4588_p7 = pnand %p4586_p6, %p4583_p5 }
 0xa3c   :  { %4591 = shalt.err (!%p4588_p7)
}
 0xa3d   :  { %3560 = dma.vmem_to_hbm [thread:$0]  %s3555_s16, 256, %s5080_s15, [#allocation4], %s4610_s18, %s4610_s18, %s4611_s1  }
 0xa3e   :  { %4600 = dma.done.wait [#allocation4], 256  }
 0xa3f   :  { %4601 = vsyncadd [#allocation4], 4294967040 }
 0xa40   :  { %3564 = vsyncpa [#allocation3], 1 }
 0xa41   :  { %3565 = vsyncpa [#allocation6], 1 }
 0xa42   :  { %3566 = vsyncpa [#allocation9], 1 }
 0xa43   :  { %3567 = vsyncpa [#allocation12], 1 }
 0xa44   :  { %3568 = vsyncpa [#allocation4], 1 }

</bundles_post_ra>
